<compile_context>
chip_gen: v7x
topology: tpu7x:2x2x1
jax: 0.10.0
libtpu: 0.0.40
codegen_flags: <defaults>
</compile_context>

<pallas_src>
import functools
import math

import jax
import jax.numpy as jnp
from jax.experimental import pallas as pl
from jax.experimental.pallas import tpu as pltpu


# ----------------------------- math helpers ----------------------------------

def _layernorm(x, g, b, eps):
    mu = jnp.mean(x, axis=-1, keepdims=True)
    var = jnp.mean(jnp.square(x - mu), axis=-1, keepdims=True)
    return (x - mu) * jax.lax.rsqrt(var + eps) * g + b


def _softmax_last(x):
    m = jnp.max(x, axis=-1, keepdims=True)
    e = jnp.exp(x - m)
    return e / jnp.sum(e, axis=-1, keepdims=True)


def _gelu_exact(x):
    # matches the PyTorch module's erf-based gelu
    return x * 0.5 * (1.0 + jax.lax.erf(x / math.sqrt(2.0)))


# --------------------------------- kernel -------------------------------------

def _encoder_kernel(x_ref, mask_ref, pbias_ref,
                    wqkv_ref, bqkv_ref,
                    wd_ref, bd_ref, ln1g_ref, ln1b_ref,
                    w1_ref, b1_ref, w2_ref, b2_ref, ln2g_ref, ln2b_ref,
                    out_ref,
                    h_scratch,
                    *, n_heads, eps):
    layer = pl.program_id(1)

    # Load the external input only for the first layer of each batch block.
    @pl.when(layer == 0)
    def _():
        h_scratch[...] = x_ref[...].astype(jnp.float32)

    x3 = h_scratch[...]                      # [Bb, S, H]
    Bb, S, H = x3.shape
    dh = H // n_heads
    inv_sqrt_dh = 1.0 / math.sqrt(dh)

    x2 = x3.reshape(Bb * S, H)               # flatten batch*seq rows for matmuls
    mask = mask_ref[...]                     # [Bb, S, S]
    pb_all = pbias_ref[0]                    # [n_heads, S, S] (precomputed)

    # --- fused Q/K/V projection on the MXU ---
    qkv = jnp.dot(x2, wqkv_ref[0], preferred_element_type=jnp.float32) + bqkv_ref[0]
    qkv3 = qkv.reshape(Bb, S, 3 * H)

    wd = wd_ref[0]                           # [H, H]
    attn_out = None
    item_parts = []
    for h in range(n_heads):                 # static, tiny head loop
        s0 = h * dh
        qh = qkv3[:, :, s0:s0 + dh]                  # [Bb, S, dh]
        kh = qkv3[:, :, H + s0:H + s0 + dh]
        vh = qkv3[:, :, 2 * H + s0:2 * H + s0 + dh]

        scores = jnp.einsum('bqd,bkd->bqk', qh, kh,
                            preferred_element_type=jnp.float32) * inv_sqrt_dh
        probs = _softmax_last(scores + mask)
        ctx_item = jnp.einsum('bqk,bkd->bqd', probs, vh,
                              preferred_element_type=jnp.float32)

        pb = jnp.broadcast_to(pb_all[h], (Bb, S, S))
        ctx_pos = jnp.einsum('bqk,bkd->bqd', pb, vh,
                             preferred_element_type=jnp.float32)

        # Output projection accumulated per head: concat(ctx_h) @ W_d
        #   == sum_h ctx_h @ W_d[h*dh:(h+1)*dh, :]  (avoids the head concat).
        ctx_h = (ctx_item + ctx_pos).reshape(Bb * S, dh)
        contrib = jnp.dot(ctx_h, wd[s0:s0 + dh, :],
                          preferred_element_type=jnp.float32)
        attn_out = contrib if attn_out is None else attn_out + contrib
        item_parts.append(ctx_item)

    attn_out = attn_out + bd_ref[0]
    hidden = _layernorm(attn_out + x2, ln1g_ref[0], ln1b_ref[0], eps)

    # --- feed-forward + residual + LN ---
    ff = _gelu_exact(jnp.dot(hidden, w1_ref[0],
                             preferred_element_type=jnp.float32) + b1_ref[0])
    ff = jnp.dot(ff, w2_ref[0], preferred_element_type=jnp.float32) + b2_ref[0]
    out2 = _layernorm(ff + hidden, ln2g_ref[0], ln2b_ref[0], eps)

    out3 = out2.reshape(Bb, S, H)
    h_scratch[...] = out3                    # carry to the next layer iteration

    # Packed, lane-adjacent output: [hidden | item_head0 | item_head1 | ...].
    out_ref[0] = jnp.concatenate([out3] + item_parts, axis=-1).astype(out_ref.dtype)


# ------------------------------- wrapper ---------------------------------------

def _stack_params(layer_params):
    stacked = {k: jnp.stack([p[k] for p in layer_params]) for k in layer_params[0]}
    wqkv = jnp.concatenate([stacked["wq"], stacked["wk"], stacked["wv"]], axis=-1)
    bqkv = jnp.concatenate([stacked["bq"], stacked["bk"], stacked["bv"]], axis=-1)
    return stacked, wqkv, bqkv


def _precompute_pos_bias(pos_emb, stacked, n_heads, eps):
    """Batch-invariant positional attention bias, per layer: [L, n_heads, S, S]."""
    S, H = pos_emb.shape
    dh = H // n_heads
    pos_scaling = float(dh * 2) ** (-0.5)   # attn_scale_factor = 2 (matches module)

    def one_layer(pg, pb, wq, bq, wk, bk):
        pn = _layernorm(pos_emb, pg, pb, eps)              # [S, H]
        pq = (pn @ wq + bq) * pos_scaling
        pk = pn @ wk + bk
        pqh = pq.reshape(S, n_heads, dh).transpose(1, 0, 2)
        pkh = pk.reshape(S, n_heads, dh).transpose(1, 0, 2)
        sc = jnp.einsum('hqd,hkd->hqk', pqh, pkh) / math.sqrt(dh)
        return jax.nn.softmax(sc, axis=-1)                 # no mask (matches module)

    return jax.vmap(one_layer)(stacked["pln_g"], stacked["pln_b"],
                               stacked["wpq"], stacked["bpq"],
                               stacked["wpk"], stacked["bpk"])


def light_transformer_encoder(x, attention_mask, pos_emb, layer_params, *,
                              n_heads, eps, output_all_encoded_layers=True,
                              batch_block=None):
    """Mirrors LightTransformerEncoder.forward (eval mode).
    Returns a list of [hidden_states, hidden_states_item] pairs."""
    B, S, H = x.shape
    L = len(layer_params)
    if batch_block is None:
        batch_block = B          # one grid step over batch (best on 1-TC chips);
                                 # pass batch_block=B//2 to feed both v7x cores.
    assert B % batch_block == 0
    nb = B // batch_block

    stacked, wqkv, bqkv = _stack_params(layer_params)
    pbias = _precompute_pos_bias(pos_emb, stacked, n_heads, eps)      # [L, nh, S, S]
    mask = jnp.broadcast_to(attention_mask, (B, 1, S, S)).reshape(B, S, S)
    mask = mask.astype(jnp.float32)

    kernel = functools.partial(_encoder_kernel, n_heads=n_heads, eps=eps)

    def layer_spec(a):
        nd = a.ndim
        return pl.BlockSpec((1,) + a.shape[1:],
                            lambda b, l, _nd=nd: (l,) + (0,) * (_nd - 1))

    weight_arrays = [
        wqkv, bqkv,
        stacked["wd"], stacked["bd"], stacked["ln1_g"], stacked["ln1_b"],
        stacked["w1"], stacked["b1"], stacked["w2"], stacked["b2"],
        stacked["ln2_g"], stacked["ln2_b"],
    ]
    weight_specs = [layer_spec(a) for a in weight_arrays]

    grid_spec = pltpu.PrefetchScalarGridSpec(
        num_scalar_prefetch=0,
        grid=(nb, L),                                        # layers innermost
        in_specs=[pl.BlockSpec((batch_block, S, H), lambda b, l: (b, 0, 0)),
                  pl.BlockSpec((batch_block, S, S), lambda b, l: (b, 0, 0)),
                  pl.BlockSpec((1, n_heads, S, S), lambda b, l: (l, 0, 0, 0))]
                 + weight_specs,
        out_specs=pl.BlockSpec((1, batch_block, S, 2 * H),
                               lambda b, l: (l, b, 0, 0)),
        scratch_shapes=[pltpu.VMEM((batch_block, S, H), jnp.float32)],
    )

    packed = pl.pallas_call(
        kernel,
        out_shape=jax.ShapeDtypeStruct((L, B, S, 2 * H), x.dtype),
        grid_spec=grid_spec,
        compiler_params=pltpu.CompilerParams(
            dimension_semantics=("parallel", "arbitrary")),
    )(x, mask, pbias, *weight_arrays)

    hidden_all = packed[..., :H]      # [L, B, S, H]
    item_all = packed[..., H:]        # [L, B, S, H]

    all_layers = []
    if output_all_encoded_layers:
        for l in range(L):
            all_layers.append([hidden_all[l], item_all[l]])
    else:
        all_layers.append([hidden_all[-1], item_all[-1]])
    return all_layers


# ------------------------ pure-JAX reference (correctness) ---------------------

def _reference_layer(x, mask4, pos_emb, p, n_heads, eps):
    B, S, H = x.shape
    dh = H // n_heads

    def heads(t):
        return t.reshape(B, S, n_heads, dh).transpose(0, 2, 1, 3)

    q = heads(x @ p["wq"] + p["bq"])
    k = heads(x @ p["wk"] + p["bk"])
    v = heads(x @ p["wv"] + p["bv"])
    scores = jnp.einsum('bhqd,bhkd->bhqk', q, k) / math.sqrt(dh) + mask4
    probs = jax.nn.softmax(scores, axis=-1)
    ctx_item = jnp.einsum('bhqk,bhkd->bhqd', probs, v)

    pos_scaling = float(dh * 2) ** (-0.5)
    pos_n = _layernorm(pos_emb, p["pln_g"], p["pln_b"], eps)
    pq = ((pos_n @ p["wpq"] + p["bpq"]) * pos_scaling).reshape(S, n_heads, dh).transpose(1, 0, 2)
    pk = (pos_n @ p["wpk"] + p["bpk"]).reshape(S, n_heads, dh).transpose(1, 0, 2)
    pbias = jax.nn.softmax(jnp.einsum('hqd,hkd->hqk', pq, pk) / math.sqrt(dh), axis=-1)
    ctx_pos = jnp.einsum('hqk,bhkd->bhqd', pbias, v)

    ctx = (ctx_item + ctx_pos).transpose(0, 2, 1, 3).reshape(B, S, H)
    attn = _layernorm(ctx @ p["wd"] + p["bd"] + x, p["ln1_g"], p["ln1_b"], eps)
    item = ctx_item.transpose(0, 2, 1, 3).reshape(B, S, H)

    ff = _gelu_exact(attn @ p["w1"] + p["b1"]) @ p["w2"] + p["b2"]
    out = _layernorm(ff + attn, p["ln2_g"], p["ln2_b"], eps)
    return out, item


def _reference_encoder(x, attention_mask, pos_emb, layer_params, *, n_heads, eps,
                       output_all_encoded_layers=True):
    all_layers = []
    hidden, item = x, None
    for p in layer_params:
        hidden, item = _reference_layer(hidden, attention_mask, pos_emb, p,
                                        n_heads, eps)
        if output_all_encoded_layers:
            all_layers.append([hidden, item])
    if not output_all_encoded_layers:
        all_layers.append([hidden, item])
    return all_layers


# --------------------------- deterministic init ---------------------------------

def init_layer_params(key, hidden, inner):
    ks = jax.random.split(key, 12)

    def lin(k, din, dout):
        kw, kb = jax.random.split(k)
        w = jax.random.normal(kw, (din, dout), jnp.float32) * 0.02
        b = jax.random.normal(kb, (1, dout), jnp.float32) * 0.02
        return w, b

    p = {}
    p["wq"], p["bq"] = lin(ks[0], hidden, hidden)
    p["wk"], p["bk"] = lin(ks[1], hidden, hidden)
    p["wv"], p["bv"] = lin(ks[2], hidden, hidden)
    p["wpq"], p["bpq"] = lin(ks[3], hidden, hidden)
    p["wpk"], p["bpk"] = lin(ks[4], hidden, hidden)
    p["pln_g"] = jnp.ones((1, hidden), jnp.float32)
    p["pln_b"] = jnp.zeros((1, hidden), jnp.float32)
    p["wd"], p["bd"] = lin(ks[5], hidden, hidden)
    p["ln1_g"] = jnp.ones((1, hidden), jnp.float32)
    p["ln1_b"] = jnp.zeros((1, hidden), jnp.float32)
    p["w1"], p["b1"] = lin(ks[6], hidden, inner)
    p["w2"], p["b2"] = lin(ks[7], inner, hidden)
    p["ln2_g"] = jnp.ones((1, hidden), jnp.float32)
    p["ln2_b"] = jnp.zeros((1, hidden), jnp.float32)
    return p


# ------------------------------------ main --------------------------------------

if __name__ == "__main__":
    B, S, H = 2, 8, 32
    N_HEADS = 2
    INNER = 64
    N_LAYERS = 2
    EPS = 1e-12

    key = jax.random.PRNGKey(0)
    k_x, k_pos, k_p = jax.random.split(key, 3)

    x = jax.random.normal(k_x, (B, S, H), jnp.float32)
    pos_emb = jax.random.normal(k_pos, (S, H), jnp.float32)

    # extended causal attention mask: 0 where attended, -10000 where masked
    causal = jnp.tril(jnp.ones((S, S), jnp.float32))
    attention_mask = jnp.broadcast_to((1.0 - causal) * -10000.0, (B, 1, S, S))

    layer_params = [init_layer_params(jax.random.fold_in(k_p, l), H, INNER)
                    for l in range(N_LAYERS)]

    # TODO(synk): dropout layers are identity here (eval-mode forward semantics).
    outputs = light_transformer_encoder(
        x, attention_mask, pos_emb, layer_params,
        n_heads=N_HEADS, eps=EPS, output_all_encoded_layers=True)

    ref_outputs = _reference_encoder(
        x, attention_mask, pos_emb, layer_params,
        n_heads=N_HEADS, eps=EPS, output_all_encoded_layers=True)

    for (hs, it), (rhs, rit) in zip(outputs, ref_outputs):
        jax.block_until_ready(hs)
        jax.block_until_ready(it)
        assert hs.shape == (B, S, H) and it.shape == (B, S, H)
        assert float(jnp.max(jnp.abs(hs - rhs))) < 1e-3, "hidden mismatch vs reference"
        assert float(jnp.max(jnp.abs(it - rit))) < 1e-3, "item mismatch vs reference"

    print("KERNEL_OK")
</pallas_src>

<mosaic_0001>
module attributes {stable_mosaic.version = 11 : i64} {
  func.func @_encoder_kernel(%arg0: i32, %arg1: i32, %arg2: memref<2x8x32xf32, #tpu.memory_space<vmem>>, %arg3: memref<2x8x8xf32, #tpu.memory_space<vmem>>, %arg4: memref<1x2x8x8xf32, #tpu.memory_space<vmem>>, %arg5: memref<1x32x96xf32, #tpu.memory_space<vmem>>, %arg6: memref<1x1x96xf32, #tpu.memory_space<vmem>>, %arg7: memref<1x32x32xf32, #tpu.memory_space<vmem>>, %arg8: memref<1x1x32xf32, #tpu.memory_space<vmem>>, %arg9: memref<1x1x32xf32, #tpu.memory_space<vmem>>, %arg10: memref<1x1x32xf32, #tpu.memory_space<vmem>>, %arg11: memref<1x32x64xf32, #tpu.memory_space<vmem>>, %arg12: memref<1x1x64xf32, #tpu.memory_space<vmem>>, %arg13: memref<1x64x32xf32, #tpu.memory_space<vmem>>, %arg14: memref<1x1x32xf32, #tpu.memory_space<vmem>>, %arg15: memref<1x1x32xf32, #tpu.memory_space<vmem>>, %arg16: memref<1x1x32xf32, #tpu.memory_space<vmem>>, %arg17: memref<1x2x8x64xf32, #tpu.memory_space<vmem>>, %arg18: memref<2x8x32xf32, #tpu.memory_space<vmem>>) attributes {dimension_semantics = [#tpu.dimension_semantics<parallel>, #tpu.dimension_semantics<arbitrary>], iteration_bounds = array<i64: 1, 2>, scalar_prefetch = 0 : i64, scratch_operands = 1 : i64, tpu.core_type = #tpu.core_type<tc>, window_params = [{transform_indices = @transform_0, window_bounds = array<i64: 2, 8, 32>}, {transform_indices = @transform_1, window_bounds = array<i64: 2, 8, 8>}, {transform_indices = @transform_2, window_bounds = array<i64: 1, 2, 8, 8>}, {transform_indices = @transform_3, window_bounds = array<i64: 1, 32, 96>}, {transform_indices = @transform_4, window_bounds = array<i64: 1, 1, 96>}, {transform_indices = @transform_5, window_bounds = array<i64: 1, 32, 32>}, {transform_indices = @transform_6, window_bounds = array<i64: 1, 1, 32>}, {transform_indices = @transform_7, window_bounds = array<i64: 1, 1, 32>}, {transform_indices = @transform_8, window_bounds = array<i64: 1, 1, 32>}, {transform_indices = @transform_9, window_bounds = array<i64: 1, 32, 64>}, {transform_indices = @transform_10, window_bounds = array<i64: 1, 1, 64>}, {transform_indices = @transform_11, window_bounds = array<i64: 1, 64, 32>}, {transform_indices = @transform_12, window_bounds = array<i64: 1, 1, 32>}, {transform_indices = @transform_13, window_bounds = array<i64: 1, 1, 32>}, {transform_indices = @transform_14, window_bounds = array<i64: 1, 1, 32>}, {transform_indices = @transform_15, window_bounds = array<i64: 1, 2, 8, 64>}]} {
    %c0_i32 = arith.constant 0 : i32
    %0 = arith.cmpi eq, %arg1, %c0_i32 : i32
    %1 = arith.extui %0 : i1 to i32
    %c0_i32_0 = arith.constant 0 : i32
    %2 = arith.cmpi ne, %1, %c0_i32_0 : i32
    scf.if %2 {
      %c0_82 = arith.constant 0 : index
      %c0_83 = arith.constant 0 : index
      %c0_84 = arith.constant 0 : index
      %157 = vector.load %arg2[%c0_82, %c0_83, %c0_84] : memref<2x8x32xf32, #tpu.memory_space<vmem>>, vector<2x8x32xf32>
      %c0_85 = arith.constant 0 : index
      %c0_86 = arith.constant 0 : index
      %c0_87 = arith.constant 0 : index
      %158 = vector.load %arg18[%c0_85, %c0_86, %c0_87] : memref<2x8x32xf32, #tpu.memory_space<vmem>>, vector<2x8x32xf32>
      tpu.vector_store %arg18[%c0_85, %c0_86, %c0_87], %157 {strides = array<i32>} : memref<2x8x32xf32, #tpu.memory_space<vmem>>, vector<2x8x32xf32>,
    } else {
    }
    %c0 = arith.constant 0 : index
    %c0_1 = arith.constant 0 : index
    %c0_2 = arith.constant 0 : index
    %3 = vector.load %arg18[%c0, %c0_1, %c0_2] : memref<2x8x32xf32, #tpu.memory_space<vmem>>, vector<2x8x32xf32>
    %4 = vector.shape_cast %3 : vector<2x8x32xf32> to vector<16x32xf32>
    %c0_3 = arith.constant 0 : index
    %c0_4 = arith.constant 0 : index
    %c0_5 = arith.constant 0 : index
    %5 = vector.load %arg3[%c0_3, %c0_4, %c0_5] : memref<2x8x8xf32, #tpu.memory_space<vmem>>, vector<2x8x8xf32>
    %c0_6 = arith.constant 0 : index
    %c0_7 = arith.constant 0 : index
    %c0_8 = arith.constant 0 : index
    %c0_9 = arith.constant 0 : index
    %6 = vector.load %arg4[%c0_6, %c0_7, %c0_8, %c0_9] : memref<1x2x8x8xf32, #tpu.memory_space<vmem>>, vector<1x2x8x8xf32>
    %7 = vector.shape_cast %6 : vector<1x2x8x8xf32> to vector<2x8x8xf32>
    %c0_10 = arith.constant 0 : index
    %c0_11 = arith.constant 0 : index
    %c0_12 = arith.constant 0 : index
    %8 = vector.load %arg5[%c0_10, %c0_11, %c0_12] : memref<1x32x96xf32, #tpu.memory_space<vmem>>, vector<1x32x96xf32>
    %9 = vector.shape_cast %8 : vector<1x32x96xf32> to vector<32x96xf32>
    %cst = arith.constant dense<0.000000e+00> : vector<16x96xf32>
    %10 = tpu.matmul %4, %9, %cst {dimension_numbers = #tpu.dot_dimension_numbers<[1], [0], [0], [1], [0, 0, 1, 1], [], []>} : vector<16x32xf32>, vector<32x96xf32>, vector<16x96xf32> -> vector<16x96xf32>
    %c0_13 = arith.constant 0 : index
    %c0_14 = arith.constant 0 : index
    %c0_15 = arith.constant 0 : index
    %11 = vector.load %arg6[%c0_13, %c0_14, %c0_15] : memref<1x1x96xf32, #tpu.memory_space<vmem>>, vector<1x1x96xf32>
    %12 = vector.shape_cast %11 : vector<1x1x96xf32> to vector<1x96xf32>
    %13 = vector.broadcast %12 : vector<1x96xf32> to vector<16x96xf32>
    %14 = arith.addf %10, %13 : vector<16x96xf32>
    %15 = vector.shape_cast %14 : vector<16x96xf32> to vector<2x8x96xf32>
    %c0_16 = arith.constant 0 : index
    %c0_17 = arith.constant 0 : index
    %c0_18 = arith.constant 0 : index
    %16 = vector.load %arg7[%c0_16, %c0_17, %c0_18] : memref<1x32x32xf32, #tpu.memory_space<vmem>>, vector<1x32x32xf32>
    %17 = vector.shape_cast %16 : vector<1x32x32xf32> to vector<32x32xf32>
    %18 = vector.extract_strided_slice %15 {offsets = [0, 0, 0], sizes = [2, 8, 16], strides = [1, 1, 1]} : vector<2x8x96xf32> to vector<2x8x16xf32>
    %19 = vector.extract_strided_slice %15 {offsets = [0, 0, 32], sizes = [2, 8, 16], strides = [1, 1, 1]} : vector<2x8x96xf32> to vector<2x8x16xf32>
    %20 = vector.extract_strided_slice %15 {offsets = [0, 0, 64], sizes = [2, 8, 16], strides = [1, 1, 1]} : vector<2x8x96xf32> to vector<2x8x16xf32>
    "tpu.trace_start"() <{level = 10 : i32, message = "bqd,bkd->bqk"}> : () -> ()
    %cst_19 = arith.constant dense<0.000000e+00> : vector<2x8x8xf32>
    %21 = tpu.matmul %18, %19, %cst_19 {dimension_numbers = #tpu.dot_dimension_numbers<[2], [2], [1], [1], [0, 0, 0, 1, 1, 1], [0], [0]>} : vector<2x8x16xf32>, vector<2x8x16xf32>, vector<2x8x8xf32> -> vector<2x8x8xf32>
    "tpu.trace_stop"() : () -> ()
    %cst_20 = arith.constant 2.500000e-01 : f32
    %22 = vector.broadcast %cst_20 : f32 to vector<2x8x8xf32>
    %23 = arith.mulf %21, %22 : vector<2x8x8xf32>
    %24 = arith.addf %23, %5 : vector<2x8x8xf32>
    %cst_21 = arith.constant dense<0xFF800000> : vector<2x8xf32>
    %25 = vector.multi_reduction <maximumf>, %24, %cst_21 [2] : vector<2x8x8xf32> to vector<2x8xf32>
    %26 = vector.shape_cast %25 : vector<2x8xf32> to vector<2x8x1xf32>
    %27 = vector.broadcast %26 : vector<2x8x1xf32> to vector<2x8x8xf32>
    %28 = arith.subf %24, %27 : vector<2x8x8xf32>
    %29 = math.exp %28 : vector<2x8x8xf32>
    %cst_22 = arith.constant dense<0.000000e+00> : vector<2x8xf32>
    %30 = vector.multi_reduction <add>, %29, %cst_22 [2] : vector<2x8x8xf32> to vector<2x8xf32>
    %31 = vector.shape_cast %30 : vector<2x8xf32> to vector<2x8x1xf32>
    %32 = vector.broadcast %31 : vector<2x8x1xf32> to vector<2x8x8xf32>
    %33 = arith.divf %29, %32 : vector<2x8x8xf32>
    "tpu.trace_start"() <{level = 10 : i32, message = "bqk,bkd->bqd"}> : () -> ()
    %cst_23 = arith.constant dense<0.000000e+00> : vector<2x8x16xf32>
    %34 = tpu.matmul %33, %20, %cst_23 {dimension_numbers = #tpu.dot_dimension_numbers<[2], [1], [1], [2], [0, 0, 0, 1, 1, 2], [0], [0]>} : vector<2x8x8xf32>, vector<2x8x16xf32>, vector<2x8x16xf32> -> vector<2x8x16xf32>
    "tpu.trace_stop"() : () -> ()
    %35 = vector.extract_strided_slice %7 {offsets = [0, 0, 0], sizes = [1, 8, 8], strides = [1, 1, 1]} : vector<2x8x8xf32> to vector<1x8x8xf32>
    %36 = vector.shape_cast %35 : vector<1x8x8xf32> to vector<8x8xf32>
    %37 = vector.shape_cast %36 : vector<8x8xf32> to vector<1x8x8xf32>
    %38 = vector.broadcast %37 : vector<1x8x8xf32> to vector<2x8x8xf32>
    "tpu.trace_start"() <{level = 10 : i32, message = "bqk,bkd->bqd"}> : () -> ()
    %cst_24 = arith.constant dense<0.000000e+00> : vector<2x8x16xf32>
    %39 = tpu.matmul %38, %20, %cst_24 {dimension_numbers = #tpu.dot_dimension_numbers<[2], [1], [1], [2], [0, 0, 0, 1, 1, 2], [0], [0]>} : vector<2x8x8xf32>, vector<2x8x16xf32>, vector<2x8x16xf32> -> vector<2x8x16xf32>
    "tpu.trace_stop"() : () -> ()
    %40 = arith.addf %34, %39 : vector<2x8x16xf32>
    %41 = vector.shape_cast %40 : vector<2x8x16xf32> to vector<16x16xf32>
    %42 = vector.extract_strided_slice %17 {offsets = [0, 0], sizes = [16, 32], strides = [1, 1]} : vector<32x32xf32> to vector<16x32xf32>
    %cst_25 = arith.constant dense<0.000000e+00> : vector<16x32xf32>
    %43 = tpu.matmul %41, %42, %cst_25 {dimension_numbers = #tpu.dot_dimension_numbers<[1], [0], [0], [1], [0, 0, 1, 1], [], []>} : vector<16x16xf32>, vector<16x32xf32>, vector<16x32xf32> -> vector<16x32xf32>
    %44 = vector.extract_strided_slice %15 {offsets = [0, 0, 16], sizes = [2, 8, 16], strides = [1, 1, 1]} : vector<2x8x96xf32> to vector<2x8x16xf32>
    %45 = vector.extract_strided_slice %15 {offsets = [0, 0, 48], sizes = [2, 8, 16], strides = [1, 1, 1]} : vector<2x8x96xf32> to vector<2x8x16xf32>
    %46 = vector.extract_strided_slice %15 {offsets = [0, 0, 80], sizes = [2, 8, 16], strides = [1, 1, 1]} : vector<2x8x96xf32> to vector<2x8x16xf32>
    "tpu.trace_start"() <{level = 10 : i32, message = "bqd,bkd->bqk"}> : () -> ()
    %cst_26 = arith.constant dense<0.000000e+00> : vector<2x8x8xf32>
    %47 = tpu.matmul %44, %45, %cst_26 {dimension_numbers = #tpu.dot_dimension_numbers<[2], [2], [1], [1], [0, 0, 0, 1, 1, 1], [0], [0]>} : vector<2x8x16xf32>, vector<2x8x16xf32>, vector<2x8x8xf32> -> vector<2x8x8xf32>
    "tpu.trace_stop"() : () -> ()
    %cst_27 = arith.constant 2.500000e-01 : f32
    %48 = vector.broadcast %cst_27 : f32 to vector<2x8x8xf32>
    %49 = arith.mulf %47, %48 : vector<2x8x8xf32>
    %50 = arith.addf %49, %5 : vector<2x8x8xf32>
    %cst_28 = arith.constant dense<0xFF800000> : vector<2x8xf32>
    %51 = vector.multi_reduction <maximumf>, %50, %cst_28 [2] : vector<2x8x8xf32> to vector<2x8xf32>
    %52 = vector.shape_cast %51 : vector<2x8xf32> to vector<2x8x1xf32>
    %53 = vector.broadcast %52 : vector<2x8x1xf32> to vector<2x8x8xf32>
    %54 = arith.subf %50, %53 : vector<2x8x8xf32>
    %55 = math.exp %54 : vector<2x8x8xf32>
    %cst_29 = arith.constant dense<0.000000e+00> : vector<2x8xf32>
    %56 = vector.multi_reduction <add>, %55, %cst_29 [2] : vector<2x8x8xf32> to vector<2x8xf32>
    %57 = vector.shape_cast %56 : vector<2x8xf32> to vector<2x8x1xf32>
    %58 = vector.broadcast %57 : vector<2x8x1xf32> to vector<2x8x8xf32>
    %59 = arith.divf %55, %58 : vector<2x8x8xf32>
    "tpu.trace_start"() <{level = 10 : i32, message = "bqk,bkd->bqd"}> : () -> ()
    %cst_30 = arith.constant dense<0.000000e+00> : vector<2x8x16xf32>
    %60 = tpu.matmul %59, %46, %cst_30 {dimension_numbers = #tpu.dot_dimension_numbers<[2], [1], [1], [2], [0, 0, 0, 1, 1, 2], [0], [0]>} : vector<2x8x8xf32>, vector<2x8x16xf32>, vector<2x8x16xf32> -> vector<2x8x16xf32>
    "tpu.trace_stop"() : () -> ()
    %61 = vector.extract_strided_slice %7 {offsets = [1, 0, 0], sizes = [1, 8, 8], strides = [1, 1, 1]} : vector<2x8x8xf32> to vector<1x8x8xf32>
    %62 = vector.shape_cast %61 : vector<1x8x8xf32> to vector<8x8xf32>
    %63 = vector.shape_cast %62 : vector<8x8xf32> to vector<1x8x8xf32>
    %64 = vector.broadcast %63 : vector<1x8x8xf32> to vector<2x8x8xf32>
    "tpu.trace_start"() <{level = 10 : i32, message = "bqk,bkd->bqd"}> : () -> ()
    %cst_31 = arith.constant dense<0.000000e+00> : vector<2x8x16xf32>
    %65 = tpu.matmul %64, %46, %cst_31 {dimension_numbers = #tpu.dot_dimension_numbers<[2], [1], [1], [2], [0, 0, 0, 1, 1, 2], [0], [0]>} : vector<2x8x8xf32>, vector<2x8x16xf32>, vector<2x8x16xf32> -> vector<2x8x16xf32>
    "tpu.trace_stop"() : () -> ()
    %66 = arith.addf %60, %65 : vector<2x8x16xf32>
    %67 = vector.shape_cast %66 : vector<2x8x16xf32> to vector<16x16xf32>
    %68 = vector.extract_strided_slice %17 {offsets = [16, 0], sizes = [16, 32], strides = [1, 1]} : vector<32x32xf32> to vector<16x32xf32>
    %cst_32 = arith.constant dense<0.000000e+00> : vector<16x32xf32>
    %69 = tpu.matmul %67, %68, %cst_32 {dimension_numbers = #tpu.dot_dimension_numbers<[1], [0], [0], [1], [0, 0, 1, 1], [], []>} : vector<16x16xf32>, vector<16x32xf32>, vector<16x32xf32> -> vector<16x32xf32>
    %70 = arith.addf %43, %69 : vector<16x32xf32>
    %c0_33 = arith.constant 0 : index
    %c0_34 = arith.constant 0 : index
    %c0_35 = arith.constant 0 : index
    %71 = vector.load %arg8[%c0_33, %c0_34, %c0_35] : memref<1x1x32xf32, #tpu.memory_space<vmem>>, vector<1x1x32xf32>
    %72 = vector.shape_cast %71 : vector<1x1x32xf32> to vector<1x32xf32>
    %73 = vector.broadcast %72 : vector<1x32xf32> to vector<16x32xf32>
    %74 = arith.addf %70, %73 : vector<16x32xf32>
    %75 = arith.addf %74, %4 : vector<16x32xf32>
    %c0_36 = arith.constant 0 : index
    %c0_37 = arith.constant 0 : index
    %c0_38 = arith.constant 0 : index
    %76 = vector.load %arg9[%c0_36, %c0_37, %c0_38] : memref<1x1x32xf32, #tpu.memory_space<vmem>>, vector<1x1x32xf32>
    %77 = vector.shape_cast %76 : vector<1x1x32xf32> to vector<1x32xf32>
    %c0_39 = arith.constant 0 : index
    %c0_40 = arith.constant 0 : index
    %c0_41 = arith.constant 0 : index
    %78 = vector.load %arg10[%c0_39, %c0_40, %c0_41] : memref<1x1x32xf32, #tpu.memory_space<vmem>>, vector<1x1x32xf32>
    %79 = vector.shape_cast %78 : vector<1x1x32xf32> to vector<1x32xf32>
    %cst_42 = arith.constant dense<0.000000e+00> : vector<16xf32>
    %80 = vector.multi_reduction <add>, %75, %cst_42 [1] : vector<16x32xf32> to vector<16xf32>
    %81 = vector.shape_cast %80 : vector<16xf32> to vector<16x1xf32>
    %cst_43 = arith.constant 3.200000e+01 : f32
    %82 = vector.broadcast %cst_43 : f32 to vector<16x1xf32>
    %83 = arith.divf %81, %82 : vector<16x1xf32>
    %84 = vector.broadcast %83 : vector<16x1xf32> to vector<16x32xf32>
    %85 = arith.subf %75, %84 : vector<16x32xf32>
    %86 = arith.mulf %85, %85 : vector<16x32xf32>
    %cst_44 = arith.constant dense<0.000000e+00> : vector<16xf32>
    %87 = vector.multi_reduction <add>, %86, %cst_44 [1] : vector<16x32xf32> to vector<16xf32>
    %88 = vector.shape_cast %87 : vector<16xf32> to vector<16x1xf32>
    %cst_45 = arith.constant 3.200000e+01 : f32
    %89 = vector.broadcast %cst_45 : f32 to vector<16x1xf32>
    %90 = arith.divf %88, %89 : vector<16x1xf32>
    %91 = vector.broadcast %83 : vector<16x1xf32> to vector<16x32xf32>
    %92 = arith.subf %75, %91 : vector<16x32xf32>
    %cst_46 = arith.constant 9.99999996E-13 : f32
    %93 = vector.broadcast %cst_46 : f32 to vector<16x1xf32>
    %94 = arith.addf %90, %93 : vector<16x1xf32>
    %95 = math.rsqrt %94 : vector<16x1xf32>
    %96 = vector.broadcast %95 : vector<16x1xf32> to vector<16x32xf32>
    %97 = arith.mulf %92, %96 : vector<16x32xf32>
    %98 = vector.broadcast %77 : vector<1x32xf32> to vector<16x32xf32>
    %99 = arith.mulf %97, %98 : vector<16x32xf32>
    %100 = vector.broadcast %79 : vector<1x32xf32> to vector<16x32xf32>
    %101 = arith.addf %99, %100 : vector<16x32xf32>
    %c0_47 = arith.constant 0 : index
    %c0_48 = arith.constant 0 : index
    %c0_49 = arith.constant 0 : index
    %102 = vector.load %arg11[%c0_47, %c0_48, %c0_49] : memref<1x32x64xf32, #tpu.memory_space<vmem>>, vector<1x32x64xf32>
    %103 = vector.shape_cast %102 : vector<1x32x64xf32> to vector<32x64xf32>
    %cst_50 = arith.constant dense<0.000000e+00> : vector<16x64xf32>
    %104 = tpu.matmul %101, %103, %cst_50 {dimension_numbers = #tpu.dot_dimension_numbers<[1], [0], [0], [1], [0, 0, 1, 1], [], []>} : vector<16x32xf32>, vector<32x64xf32>, vector<16x64xf32> -> vector<16x64xf32>
    %c0_51 = arith.constant 0 : index
    %c0_52 = arith.constant 0 : index
    %c0_53 = arith.constant 0 : index
    %105 = vector.load %arg12[%c0_51, %c0_52, %c0_53] : memref<1x1x64xf32, #tpu.memory_space<vmem>>, vector<1x1x64xf32>
    %106 = vector.shape_cast %105 : vector<1x1x64xf32> to vector<1x64xf32>
    %107 = vector.broadcast %106 : vector<1x64xf32> to vector<16x64xf32>
    %108 = arith.addf %104, %107 : vector<16x64xf32>
    %cst_54 = arith.constant 5.000000e-01 : f32
    %109 = vector.broadcast %cst_54 : f32 to vector<16x64xf32>
    %110 = arith.mulf %108, %109 : vector<16x64xf32>
    %cst_55 = arith.constant 1.41421354 : f32
    %111 = vector.broadcast %cst_55 : f32 to vector<16x64xf32>
    %112 = arith.divf %108, %111 : vector<16x64xf32>
    %113 = math.erf %112 : vector<16x64xf32>
    %cst_56 = arith.constant 1.000000e+00 : f32
    %114 = vector.broadcast %cst_56 : f32 to vector<16x64xf32>
    %115 = arith.addf %114, %113 : vector<16x64xf32>
    %116 = arith.mulf %110, %115 : vector<16x64xf32>
    %c0_57 = arith.constant 0 : index
    %c0_58 = arith.constant 0 : index
    %c0_59 = arith.constant 0 : index
    %117 = vector.load %arg13[%c0_57, %c0_58, %c0_59] : memref<1x64x32xf32, #tpu.memory_space<vmem>>, vector<1x64x32xf32>
    %118 = vector.shape_cast %117 : vector<1x64x32xf32> to vector<64x32xf32>
    %cst_60 = arith.constant dense<0.000000e+00> : vector<16x32xf32>
    %119 = tpu.matmul %116, %118, %cst_60 {dimension_numbers = #tpu.dot_dimension_numbers<[1], [0], [0], [1], [0, 0, 1, 1], [], []>} : vector<16x64xf32>, vector<64x32xf32>, vector<16x32xf32> -> vector<16x32xf32>
    %c0_61 = arith.constant 0 : index
    %c0_62 = arith.constant 0 : index
    %c0_63 = arith.constant 0 : index
    %120 = vector.load %arg14[%c0_61, %c0_62, %c0_63] : memref<1x1x32xf32, #tpu.memory_space<vmem>>, vector<1x1x32xf32>
    %121 = vector.shape_cast %120 : vector<1x1x32xf32> to vector<1x32xf32>
    %122 = vector.broadcast %121 : vector<1x32xf32> to vector<16x32xf32>
    %123 = arith.addf %119, %122 : vector<16x32xf32>
    %124 = arith.addf %123, %101 : vector<16x32xf32>
    %c0_64 = arith.constant 0 : index
    %c0_65 = arith.constant 0 : index
    %c0_66 = arith.constant 0 : index
    %125 = vector.load %arg15[%c0_64, %c0_65, %c0_66] : memref<1x1x32xf32, #tpu.memory_space<vmem>>, vector<1x1x32xf32>
    %126 = vector.shape_cast %125 : vector<1x1x32xf32> to vector<1x32xf32>
    %c0_67 = arith.constant 0 : index
    %c0_68 = arith.constant 0 : index
    %c0_69 = arith.constant 0 : index
    %127 = vector.load %arg16[%c0_67, %c0_68, %c0_69] : memref<1x1x32xf32, #tpu.memory_space<vmem>>, vector<1x1x32xf32>
    %128 = vector.shape_cast %127 : vector<1x1x32xf32> to vector<1x32xf32>
    %cst_70 = arith.constant dense<0.000000e+00> : vector<16xf32>
    %129 = vector.multi_reduction <add>, %124, %cst_70 [1] : vector<16x32xf32> to vector<16xf32>
    %130 = vector.shape_cast %129 : vector<16xf32> to vector<16x1xf32>
    %cst_71 = arith.constant 3.200000e+01 : f32
    %131 = vector.broadcast %cst_71 : f32 to vector<16x1xf32>
    %132 = arith.divf %130, %131 : vector<16x1xf32>
    %133 = vector.broadcast %132 : vector<16x1xf32> to vector<16x32xf32>
    %134 = arith.subf %124, %133 : vector<16x32xf32>
    %135 = arith.mulf %134, %134 : vector<16x32xf32>
    %cst_72 = arith.constant dense<0.000000e+00> : vector<16xf32>
    %136 = vector.multi_reduction <add>, %135, %cst_72 [1] : vector<16x32xf32> to vector<16xf32>
    %137 = vector.shape_cast %136 : vector<16xf32> to vector<16x1xf32>
    %cst_73 = arith.constant 3.200000e+01 : f32
    %138 = vector.broadcast %cst_73 : f32 to vector<16x1xf32>
    %139 = arith.divf %137, %138 : vector<16x1xf32>
    %140 = vector.broadcast %132 : vector<16x1xf32> to vector<16x32xf32>
    %141 = arith.subf %124, %140 : vector<16x32xf32>
    %cst_74 = arith.constant 9.99999996E-13 : f32
    %142 = vector.broadcast %cst_74 : f32 to vector<16x1xf32>
    %143 = arith.addf %139, %142 : vector<16x1xf32>
    %144 = math.rsqrt %143 : vector<16x1xf32>
    %145 = vector.broadcast %144 : vector<16x1xf32> to vector<16x32xf32>
    %146 = arith.mulf %141, %145 : vector<16x32xf32>
    %147 = vector.broadcast %126 : vector<1x32xf32> to vector<16x32xf32>
    %148 = arith.mulf %146, %147 : vector<16x32xf32>
    %149 = vector.broadcast %128 : vector<1x32xf32> to vector<16x32xf32>
    %150 = arith.addf %148, %149 : vector<16x32xf32>
    %151 = vector.shape_cast %150 : vector<16x32xf32> to vector<2x8x32xf32>
    %c0_75 = arith.constant 0 : index
    %c0_76 = arith.constant 0 : index
    %c0_77 = arith.constant 0 : index
    %152 = vector.load %arg18[%c0_75, %c0_76, %c0_77] : memref<2x8x32xf32, #tpu.memory_space<vmem>>, vector<2x8x32xf32>
    tpu.vector_store %arg18[%c0_75, %c0_76, %c0_77], %151 {strides = array<i32>} : memref<2x8x32xf32, #tpu.memory_space<vmem>>, vector<2x8x32xf32>,
    %153 = tpu.concatenate %151, %34, %60 in 2 : vector<2x8x32xf32>, vector<2x8x16xf32>, vector<2x8x16xf32> -> vector<2x8x64xf32>
    %c0_78 = arith.constant 0 : index
    %c0_79 = arith.constant 0 : index
    %c0_80 = arith.constant 0 : index
    %c0_81 = arith.constant 0 : index
    %154 = vector.load %arg17[%c0_78, %c0_79, %c0_80, %c0_81] : memref<1x2x8x64xf32, #tpu.memory_space<vmem>>, vector<1x2x8x64xf32>
    %155 = vector.shape_cast %154 : vector<1x2x8x64xf32> to vector<2x8x64xf32>
    %156 = vector.shape_cast %153 : vector<2x8x64xf32> to vector<1x2x8x64xf32>
    tpu.vector_store %arg17[%c0_78, %c0_79, %c0_80, %c0_81], %156 {strides = array<i32>} : memref<1x2x8x64xf32, #tpu.memory_space<vmem>>, vector<1x2x8x64xf32>,
    return
  }
  func.func @transform_0(%arg0: i32, %arg1: i32) -> (i32, i32, i32) {
    %c0_i32 = arith.constant 0 : i32
    %c0_i32_0 = arith.constant 0 : i32
    %c0_i32_1 = arith.constant 0 : i32
    return %arg0, %c0_i32, %c0_i32_0 : i32, i32, i32
  }
  func.func @transform_1(%arg0: i32, %arg1: i32) -> (i32, i32, i32) {
    %c0_i32 = arith.constant 0 : i32
    %c0_i32_0 = arith.constant 0 : i32
    %c0_i32_1 = arith.constant 0 : i32
    return %arg0, %c0_i32, %c0_i32_0 : i32, i32, i32
  }
  func.func @transform_2(%arg0: i32, %arg1: i32) -> (i32, i32, i32, i32) {
    %c0_i32 = arith.constant 0 : i32
    %c0_i32_0 = arith.constant 0 : i32
    %c0_i32_1 = arith.constant 0 : i32
    %c0_i32_2 = arith.constant 0 : i32
    return %arg1, %c0_i32, %c0_i32_0, %c0_i32_1 : i32, i32, i32, i32
  }
  func.func @transform_3(%arg0: i32, %arg1: i32) -> (i32, i32, i32) {
    %c0_i32 = arith.constant 0 : i32
    %c0_i32_0 = arith.constant 0 : i32
    %c0_i32_1 = arith.constant 0 : i32
    return %arg1, %c0_i32, %c0_i32_0 : i32, i32, i32
  }
  func.func @transform_4(%arg0: i32, %arg1: i32) -> (i32, i32, i32) {
    %c0_i32 = arith.constant 0 : i32
    %c0_i32_0 = arith.constant 0 : i32
    %c0_i32_1 = arith.constant 0 : i32
    return %arg1, %c0_i32, %c0_i32_0 : i32, i32, i32
  }
  func.func @transform_5(%arg0: i32, %arg1: i32) -> (i32, i32, i32) {
    %c0_i32 = arith.constant 0 : i32
    %c0_i32_0 = arith.constant 0 : i32
    %c0_i32_1 = arith.constant 0 : i32
    return %arg1, %c0_i32, %c0_i32_0 : i32, i32, i32
  }
  func.func @transform_6(%arg0: i32, %arg1: i32) -> (i32, i32, i32) {
    %c0_i32 = arith.constant 0 : i32
    %c0_i32_0 = arith.constant 0 : i32
    %c0_i32_1 = arith.constant 0 : i32
    return %arg1, %c0_i32, %c0_i32_0 : i32, i32, i32
  }
  func.func @transform_7(%arg0: i32, %arg1: i32) -> (i32, i32, i32) {
    %c0_i32 = arith.constant 0 : i32
    %c0_i32_0 = arith.constant 0 : i32
    %c0_i32_1 = arith.constant 0 : i32
    return %arg1, %c0_i32, %c0_i32_0 : i32, i32, i32
  }
  func.func @transform_8(%arg0: i32, %arg1: i32) -> (i32, i32, i32) {
    %c0_i32 = arith.constant 0 : i32
    %c0_i32_0 = arith.constant 0 : i32
    %c0_i32_1 = arith.constant 0 : i32
    return %arg1, %c0_i32, %c0_i32_0 : i32, i32, i32
  }
  func.func @transform_9(%arg0: i32, %arg1: i32) -> (i32, i32, i32) {
    %c0_i32 = arith.constant 0 : i32
    %c0_i32_0 = arith.constant 0 : i32
    %c0_i32_1 = arith.constant 0 : i32
    return %arg1, %c0_i32, %c0_i32_0 : i32, i32, i32
  }
  func.func @transform_10(%arg0: i32, %arg1: i32) -> (i32, i32, i32) {
    %c0_i32 = arith.constant 0 : i32
    %c0_i32_0 = arith.constant 0 : i32
    %c0_i32_1 = arith.constant 0 : i32
    return %arg1, %c0_i32, %c0_i32_0 : i32, i32, i32
  }
  func.func @transform_11(%arg0: i32, %arg1: i32) -> (i32, i32, i32) {
    %c0_i32 = arith.constant 0 : i32
    %c0_i32_0 = arith.constant 0 : i32
    %c0_i32_1 = arith.constant 0 : i32
    return %arg1, %c0_i32, %c0_i32_0 : i32, i32, i32
  }
  func.func @transform_12(%arg0: i32, %arg1: i32) -> (i32, i32, i32) {
    %c0_i32 = arith.constant 0 : i32
    %c0_i32_0 = arith.constant 0 : i32
    %c0_i32_1 = arith.constant 0 : i32
    return %arg1, %c0_i32, %c0_i32_0 : i32, i32, i32
  }
  func.func @transform_13(%arg0: i32, %arg1: i32) -> (i32, i32, i32) {
    %c0_i32 = arith.constant 0 : i32
    %c0_i32_0 = arith.constant 0 : i32
    %c0_i32_1 = arith.constant 0 : i32
    return %arg1, %c0_i32, %c0_i32_0 : i32, i32, i32
  }
  func.func @transform_14(%arg0: i32, %arg1: i32) -> (i32, i32, i32) {
    %c0_i32 = arith.constant 0 : i32
    %c0_i32_0 = arith.constant 0 : i32
    %c0_i32_1 = arith.constant 0 : i32
    return %arg1, %c0_i32, %c0_i32_0 : i32, i32, i32
  }
  func.func @transform_15(%arg0: i32, %arg1: i32) -> (i32, i32, i32, i32) {
    %c0_i32 = arith.constant 0 : i32
    %c0_i32_0 = arith.constant 0 : i32
    %c0_i32_1 = arith.constant 0 : i32
    return %arg1, %arg0, %c0_i32, %c0_i32_0 : i32, i32, i32, i32
  }
}

</mosaic_0001>

<bundles_post_ra>
// kernel: tpu_custom_call.1
= control target key start
LH: loop header
LB: loop body
LE: loop exit
PB: predicated region body
PF: predicated region fallthrough
CT: control target
= control target key end

     0   :  { %s3779_s0 = inlined_call_operand.hbm [shape: f32[2,8,32], index: 0, kind: input, shape index: {}]   ;;  %s3780_s1 = inlined_call_operand.hbm [shape: f32[2,8,8], index: 1, kind: input, shape index: {}]   ;;  %s3781_s2 = inlined_call_operand.hbm [shape: f32[2,2,8,8], index: 2, kind: input, shape index: {}]   ;;  %s3782_s3 = inlined_call_operand.vmem [shape: f32[2,32,96], index: 3, kind: input, shape index: {}]   ;;  %s3783_s4 = inlined_call_operand.vmem [shape: f32[2,1,96], index: 4, kind: input, shape index: {}]   ;;  %s3784_s5 = inlined_call_operand.vmem [shape: f32[2,32,32], index: 5, kind: input, shape index: {}]   ;;  %s3785_s6 = inlined_call_operand.vmem [shape: f32[2,1,32], index: 6, kind: input, shape index: {}]   ;;  %s3786_s7 = inlined_call_operand.vmem [shape: f32[2,1,32], index: 7, kind: input, shape index: {}]   ;;  %s3787_s8 = inlined_call_operand.vmem [shape: f32[2,1,32], index: 8, kind: input, shape index: {}]   ;;  %s3788_s9 = inlined_call_operand.vmem [shape: f32[2,32,64], index: 9, kind: input, shape index: {}]   ;;  %s3789_s10 = inlined_call_operand.vmem [shape: f32[2,1,64], index: 10, kind: input, shape index: {}]   ;;  %s3790_s11 = inlined_call_operand.vmem [shape: f32[2,64,32], index: 11, kind: input, shape index: {}]   ;;  %s3791_s12 = inlined_call_operand.vmem [shape: f32[2,1,32], index: 12, kind: input, shape index: {}]   ;;  %s3792_s13 = inlined_call_operand.vmem [shape: f32[2,1,32], index: 13, kind: input, shape index: {}]   ;;  %s3793_s14 = inlined_call_operand.vmem [shape: f32[2,1,32], index: 14, kind: input, shape index: {}]   ;;  %s3794_s15 = inlined_call_operand.hbm [shape: f32[2,2,8,64], index: 15, kind: output, shape index: {}]  }
   0x1   :  { %3811 = sst [smem:[#allocation22_spill]] %s3779_s0 }
   0x2   :  { %3812 = sst [smem:[#allocation23_spill]] %s3780_s1 }
   0x3   :  { %3813 = sst [smem:[#allocation24_spill]] %s3781_s2 }
   0x4   :  { %3814 = sst [smem:[#allocation25_spill]] %s3782_s3 }
   0x5   :  { %3815 = sst [smem:[#allocation26_spill]] %s3784_s5 }
   0x6   :  { %3816 = sst [smem:[#allocation27_spill]] %s3787_s8 }
   0x7   :  { %3817 = sst [smem:[#allocation28_spill]] %s3788_s9 }
   0x8   :  { %3818 = sst [smem:[#allocation29_spill]] %s3789_s10 }
   0x9   :  { %3819 = sst [smem:[#allocation30_spill]] %s3790_s11 }
   0xa   :  { %3820 = sst [smem:[#allocation31_spill]] %s3791_s12 }
   0xb   :  { %3821 = sst [smem:[#allocation32_spill]] %s3792_s13 }
   0xc   :  { %3822 = sst [smem:[#allocation33_spill]] %s3793_s14 }
   0xd   :  { %3823 = sst [smem:[#allocation34_spill]] %s3794_s15 }
   0xe   :  { %20 = vsyncpa [#allocation4], 0 }
   0xf   :  { %21 = vsyncpa [#allocation7], 0 }
  0x10   :  { %22 = vsyncpa [#allocation5], 0 }
  0x11   :  { %24 = vsyncpa [#allocation5 + $0x1], 0  ;;  %s3243_s18 = smov 0   ;;  %s3245_s19 = smov 0  }
  0x12   :  { %s3247_s20 = smov 0   ;;  %s3249_s21 = smov 0  }
  0x13   :  { %s3251_s22 = smov 0   ;;  %s3253_s23 = smov 0  }
  0x14 LB: > { %3824 = sst [smem:[#allocation14_spill]] %s3125_s18  ;;  %s3274_s24 = sadd.s32 4294967295, %s3145_s23   ;;  %s3145_s23 = sphi %s3253_s23, %s30_s23   ;;  %s3141_s22 = sphi %s3251_s22, %s3881_s22   ;;  %s3137_s21 = sphi %s3249_s21, %s3880_s21   ;;  %s3133_s20 = sphi %s3247_s20, %s3879_s20   ;;  %s3129_s19 = sphi %s3245_s19, %s3883_s19   ;;  %s3125_s18 = sphi %s3243_s18, %s3882_s18  }
  0x15   : > { %3825 = sst [smem:[#allocation15_spill]] %s3133_s20  ;;  %s2568_s25 = sadd.s32 4294967294, %s3145_s23  }
  0x16   : > { %3826 = sst [smem:[#allocation16_spill]] %s3141_s22  ;;  %p108_p0 = scmp.ne.s32.totalorder %s3133_s20, %s3129_s19 }
  0x17   : > { %3827 = sst [smem:[#allocation17_spill]] %s3145_s23  ;;  %p109_p1 = scmp.eq.s32.totalorder %s3145_s23, 0 }
  0x18   : > { %p114_p2 = scmp.ne.s32.totalorder %s3129_s19, %s3125_s18  ;;  %p3800_p3 = scmp.eq.s32.totalorder %s3274_s24, 0 }
  0x19   : > { %p3283_p4 = por %p109_p1, %p108_p0  ;;  %p452_p5 = scmp.eq.s32.totalorder %s3274_s24, 1 }
  0x1a   : > { %p3290_p6 = por %p3800_p3, %p114_p2  ;;  %p458_p7 = scmp.eq.s32.totalorder %s2568_s25, 1 }
  0x1b   : > { %p3294_p8 = por %p452_p5, %p108_p0  ;;  %p2569_p9 = scmp.ge.s32.totalorder %s3145_s23, 1 }
  0x1c   : > { %s3829_s27 = scalar_select %p3290_p6, 1, 0 }
  0x1d   : > { %s3830_s28 = scalar_select %p3294_p8, 1, 0 }
  0x1e   : > { %p3299_p10 = por %p458_p7, %p114_p2  ;;  %p465_p11 = scmp.lt.s32.totalorder %s3145_s23, 3 }
  0x1f   : > { %3831 = sst [smem:[#allocation18_spill]] %s3830_s28  ;;  %s3147_s16 = smov [#allocation3]  }
  0x20   : > { %s3832_s29 = scalar_select %p3299_p10, 1, 0 }
  0x21   : > { %p3304_p12 = pnand %p2569_p9, %p465_p11  ;;  %s480_s17 = sshll.u32 %s3147_s16, 4  ;;  %s3308_s17 = int_to_ptr.vmem [resolvable:$true] %s480_s17 }
  0x22   : > { %3833 = sst [smem:[#allocation19_spill]] %s3832_s29  ;;  %p2875_p1 = scmp.lt.s32.totalorder %s3145_s23, 2 }
  0x23   : > { %p2858_p13 = pneg %p3304_p12  ;;  %s3148_s18 = smov [#allocation6]  }
  0x24   : > { %p3322_p2 = pnand %p2875_p1, %p3283_p4  ;;  %s496_s16 = sshll.u32 %s3148_s18, 4  ;;  %s3326_s16 = int_to_ptr.vmem [resolvable:$true] %s496_s16 }
  0x25   : > { %p3316_p5 = pnand %p2858_p13, %p3800_p3  ;;  %s3837_s0 = sld [smem:[#allocation22_spill]] }
  0x27   : > { %p2971_p9 = pneg %p3316_p5 }
  0x2b   : > { %s2969_s14 = scalar_lea.hbm %s3837_s0, 256 }
  0x2c   : > { %p2970_p7 = scmp.ne.s32.totalorder %s3837_s0, %s2969_s14  ;;  %p2976_p13 = scmp.lt.u32.totalorder %s2969_s14, %s3837_s0 }
  0x2e   : > { %p2972_p4 = pnand %p2971_p9, %p2970_p7 }
  0x30   : > { %p2973_p11 = pneg %p2972_p4 }
  0x32   : > { %p2978_p1 = pnand %p2976_p13, %p2973_p11 }
  0x34   : > { %2981 = shalt.err (!%p2978_p1)
}
  0x35   : > { %s2982_s15 = scalar_lea.vmem %s3308_s17, 256  ;;  %p2990_p8 = scmp.lt.s32.totalorder %s3308_s17, %s3308_s17 }
  0x36   : > { %p2983_p0 = scmp.ne.s32.totalorder %s3308_s17, %s2982_s15  ;;  %p2991_p7 = scmp.lt.s32.totalorder %s2982_s15, %s2982_s15 }
  0x38   : > { %p2985_p3 = pnand %p2983_p0, %p2971_p9  ;;  %p2992_p4 = por %p2991_p7, %p2990_p8 }
  0x3a   : > { %p2986_p10 = pneg %p2985_p3 }
  0x3c   : > { %p2993_p6 = pnand %p2992_p4, %p2986_p10 }
  0x3e   : > { %2996 = shalt.err (!%p2993_p6)
}
  0x3f   : > { %s3803_s11 = smov 128   ;;  %s3804_s12 = smov 8  }
  0x40   : > { %2861 = dma.hbm_to_vmem [thread:$0]  (!%p3316_p5), %s3837_s0, 256, %s3308_s17, [#allocation4], %s3803_s11, %s3803_s11, %s3804_s12  }
  0x41   : > { %s3838_s1 = sld [smem:[#allocation23_spill]] }
  0x47   : > { %s2997_s26 = scalar_lea.hbm %s3838_s1, 256 }
  0x48   : > { %p2998_p3 = scmp.ne.s32.totalorder %s3838_s1, %s2997_s26  ;;  %p3004_p10 = scmp.lt.u32.totalorder %s2997_s26, %s3838_s1 }
  0x4a   : > { %p3000_p6 = pnand %p2998_p3, %p2971_p9 }
  0x4c   : > { %p3001_p8 = pneg %p3000_p6 }
  0x4e   : > { %p3006_p0 = pnand %p3004_p10, %p3001_p8 }
  0x50   : > { %3009 = shalt.err (!%p3006_p0)
}
  0x51   : > { %s3010_s17 = scalar_lea.vmem %s3326_s16, 256  ;;  %p3018_p7 = scmp.lt.s32.totalorder %s3326_s16, %s3326_s16 }
  0x52   : > { %p3011_p11 = scmp.ne.s32.totalorder %s3326_s16, %s3010_s17  ;;  %p3019_p4 = scmp.lt.s32.totalorder %s3010_s17, %s3010_s17 }
  0x54   : > { %p3013_p13 = pnand %p3011_p11, %p2971_p9  ;;  %p3020_p3 = por %p3019_p4, %p3018_p7 }
  0x56   : > { %p3014_p1 = pneg %p3013_p13 }
  0x58   : > { %p3021_p6 = pnand %p3020_p3, %p3014_p1 }
  0x5a   : > { %3024 = shalt.err (!%p3021_p6)
}
  0x5b   : > { %2864 = dma.hbm_to_vmem [thread:$0]  (!%p3316_p5), %s3838_s1, 256, %s3326_s16, [#allocation7], %s3803_s11, %s3803_s11, %s3804_s12  }
  0x5c   : > { %s101_s10 = sadd.s32 1, %s3133_s20  ;;  %s39_s13 = sadd.s32 1, %s3141_s22 }
  0x5d   : > { %s510_s14 = sand.u32 1, %s3145_s23   ;;  %p40_p9 = scmp.ge.s32.totalorder %s39_s13, 2 }
  0x5e   : > { %s512_s25 = sand.u32 1, %s3133_s20   ;;  %s2629_s18 = sshll.u32 %s3141_s22, 8 }
  0x5f   : > { %s3885_s13 = smov (%p40_p9, %s39_s13), 0  ;;  %s2573_s28 = sshll.u32 %s512_s25, 4 }
  0x60   : > { %3839 = sst [smem:[#allocation20_spill]] %s3885_s13  ;;  %s3840_s2 = sld [smem:[#allocation24_spill]] }
  0x61   : > { %s98_s16 = ssub.s32 %s3141_s22, %s3885_s13  ;;  %s514_s8 = scalar_lea.vmem [#allocation8], %s2573_s28 }
  0x62   : > { %p99_p5 = scmp.eq.s32.totalorder %s98_s16, 0  ;;  %s521_s9 = sshll.u32 %s514_s8, 4  ;;  %s3400_s9 = int_to_ptr.vmem [resolvable:$true] %s521_s9 }
  0x63   : > { %s3405_s12 = scalar_lea.sflag [#allocation4], %s510_s14  ;;  %p3027_p10 = pneg %p3322_p2 }
  0x64   : > { %s3403_s11 = scalar_select %p99_p5, %s3133_s20, %s101_s10  }
  0x66   : > { %s3396_s17 = scalar_lea.hbm %s3840_s2, %s2629_s18  ;;  %3841 = sst [smem:[#allocation21_spill]] %s3403_s11 }
  0x67   : > { %s3025_s25 = scalar_lea.hbm %s3396_s17, 256  ;;  %s3030_s15 = scalar_lea.hbm %s3840_s2, 512 }
  0x68   : > { %p3026_p8 = scmp.ne.s32.totalorder %s3396_s17, %s3025_s25  ;;  %p3031_p13 = scmp.lt.u32.totalorder %s3396_s17, %s3840_s2 }
  0x69   : > { %p3032_p1 = scmp.lt.u32.totalorder %s3030_s15, %s3025_s25  ;;  %p3034_p4 = scmp.lt.u32.totalorder %s3025_s25, %s3396_s17 }
  0x6a   : > { %p3028_p0 = pnand %p3027_p10, %p3026_p8 }
  0x6b   : > { %p3033_p7 = por %p3032_p1, %p3031_p13 }
  0x6c   : > { %p3029_p11 = pneg %p3028_p0 }
  0x6d   : > { %p3035_p3 = por %p3034_p4, %p3033_p7 }
  0x6f   : > { %p3036_p6 = pnand %p3035_p3, %p3029_p11 }
  0x71   : > { %3039 = shalt.err (!%p3036_p6)
}
  0x72   : > { %s3040_s10 = scalar_lea.vmem %s3400_s9, 256  ;;  %s3151_s14 = smov [#allocation8]  }
  0x73   : > { %p3041_p9 = scmp.ne.s32.totalorder %s3400_s9, %s3040_s10  ;;  %s3045_s8 = sshll.u32 %s3151_s14, 4  ;;  %s3046_s8 = int_to_ptr.vmem [resolvable:$false] %s3045_s8 }
  0x74   : > { %s3047_s18 = scalar_lea.vmem %s3046_s8, 512  ;;  %p3048_p0 = scmp.lt.s32.totalorder %s3400_s9, %s3046_s8 }
  0x75   : > { %p3043_p5 = pnand %p3041_p9, %p3027_p10  ;;  %p3049_p13 = scmp.lt.s32.totalorder %s3047_s18, %s3040_s10 }
  0x77   : > { %p3044_p8 = pneg %p3043_p5  ;;  %p3050_p1 = por %p3049_p13, %p3048_p0 }
  0x79   : > { %p3051_p7 = pnand %p3050_p1, %p3044_p8 }
  0x7b   : > { %3054 = shalt.err (!%p3051_p7)
}
  0x7c   : > { %s3842_s25 = smov 8   ;;  %s3843_s26 = smov 128  }
  0x7d   : > { %2868 = dma.hbm_to_vmem [thread:$0]  (!%p3322_p2), %s3396_s17, 256, %s3400_s9, %s3405_s12, %s3843_s26, %s3843_s26, %s3842_s25  }
  0x7e   : > { %613 = sbr.rel (%p3304_p12) target bundleno = 3115 (0xc2b), region = 80  ;;  %p3844_p10 = scmp.eq.s32.totalorder (!%p3304_p12), %s3274_s24, 0 }
  0x85   : > { %3108 = dma.done.wait (%p3844_p10), [#allocation4], 256   ;;  %p3845_p11 = pmov %p3844_p10 }
  0x86   : > { %p3846_p4 = pmov %p3844_p10 }
  0x87   : > { %3110 = vsyncadd (%p3845_p11), [#allocation4], 4294967040 }
  0x88   : > { %3112 = dma.done.wait (%p3846_p4), [#allocation7], 256   ;;  %p3847_p3 = pmov %p3846_p4 }
  0x89   : > { %s623_s29 = sand.u32 1, %s3274_s24   ;;  %s3805_s12 = sand.u32 1, %s3129_s19  }
  0x8a   : > { %3114 = vsyncadd (%p3847_p3), [#allocation7], 4294967040  ;;  %s3450_s30 = sshll.u32 %s3805_s12, 4  ;;  %s624_s17 = scalar_lea.sflag [#allocation4], %s623_s29 }
  0x8b   : > { %p3848_p12 = scmp.ne.s32.totalorder %s3829_s27, 0 }
  0x8d   : > { %3116 = dma.done.wait (%p3848_p12), %s624_s17, 256  }
  0x8e   : > { %3118 = vsyncadd (%p3848_p12), %s624_s17, 4294967040  ;;  %p720_p2 = scmp.lt.s32.totalorder %s3137_s21, 1  ;;  %s3849_s3 = sld [smem:[#allocation25_spill]] }
  0x8f   : > { %s3850_s5 = sld [smem:[#allocation26_spill]]  ;;  %s3852_s14 = sld [smem:[#allocation28_spill]] }
  0x90   : > { %s3459_s15 = scalar_select %p720_p2, %s3137_s21, 1 }
  0x91   : > { %s3854_s12 = sld [smem:[#allocation30_spill]]  ;;  %s3855_s1 = sld [smem:[#allocation31_spill]] }
  0x92   : > { %s2630_s24 = sshll.u32 %s3459_s15, 5  ;;  %s2633_s11 = sshll.u32 %s3459_s15, 6 }
  0x93   : > { %s3856_s16 = sld [smem:[#allocation32_spill]]  ;;  %s3514_s18 = scalar_lea.vmem [#allocation9], %s3450_s30 }
  0x94   : > { %s724_s8 = scalar_lea.vmem %s3849_s3, %s2630_s24  ;;  %p2589_p6 = scmp.ne.s32.totalorder %s3137_s21, 0 }
  0x95   : > { %s3472_s26 = scalar_lea.vmem %s3850_s5, %s2630_s24  ;;  %s3489_s3 = scalar_lea.vmem %s3852_s14, %s2630_s24  ;;  %v769_v0 = vld [vmem:[#allocation3] sm:$0xff] (!%p2589_p6)  ;;  %vm771_vm0 = vcmask (!%p2589_p6), 261120   ;;  %v770_v1 = vld [vmem:[#allocation3 + $0x8] sm:$0xff] (!%p2589_p6) }
  0x96   : > { %s3853_s5 = sld [smem:[#allocation29_spill]]  ;;  %s3857_s14 = sld [smem:[#allocation33_spill]]  ;;  %772 = vst.msk [vmem:[#allocation2] sm:$0xff] (!%p2589_p6), %vm771_vm0, %v769_v0  ;;  %773 = vst.msk [vmem:[#allocation2 + $0x8] sm:$0xff] (!%p2589_p6), %vm771_vm0, %v770_v1 }
  0x97   : > { %s3499_s20 = scalar_lea.vmem %s3854_s12, %s2633_s11  ;;  %s757_s2 = scalar_lea.vmem %s3855_s1, %s3459_s15 }
  0x98   : > { %768 = sbr.rel (%p2589_p6) target bundleno = 159 (0x9f), region = 96 }
  0x99   : > { %s760_s13 = scalar_lea.vmem %s3856_s16, %s3459_s15 }
  0x9c   : > { %s749_s22 = scalar_lea.vmem %s3853_s5, %s3459_s15  ;;  %s763_s23 = scalar_lea.vmem %s3857_s14, %s3459_s15 }
  0x9f PF: > { %v780_v2 = vld [vmem:[%s724_s8] sm:$0xff]  ;;  %v781_v3 = vld [vmem:[%s724_s8 + $0x8] sm:$0xff]  ;;  %v782_v4 = vld [vmem:[%s724_s8 + $0x10] sm:$0xff]  ;;  %vm791_vm1 = vcmask 261120   ;;  %v3152_v10 = vmov 0.0   ;;  %vm3153_vm2 = vmmov 0   ;;  %s3858_s11 = scalar_lea.vmem %s3783_s4, %s3459_s15  ;;  %s3861_s9 = scalar_lea.vmem %s3785_s6, %s3459_s15 }
  0xa0   : > { %v2804_v5 = vpack.c.bf16 %v781_v3, %v780_v2  ;;  %v783_v6 = vld [vmem:[%s724_s8 + $0x18] sm:$0xff]  ;;  %v3517_v7 = vld [vmem:[#allocation2] sm:$0xff]  ;;  %v3521_v9 = vld [vmem:[#allocation2 + $0x8] sm:$0xff]  ;;  %2710 = vmatprep.subr.mxu0 %v3152_v10  ;;  %2712 = vmatprep.mubr.msk.f32.mxu0 %vm3153_vm2, %v3152_v10  ;;  %s3154_s12 = smov 96   ;;  %vm880_vm3 = vcmask 130048   ;;  %vm1036_vm4 = vcmask 64512  }
  0xa1   : > { %v2808_v8 = vpack.c.bf16 %v783_v6, %v782_v4  ;;  %2697 = vmatprep.mubr.msk.f32.mxu1 %vm791_vm1, %v3517_v7  ;;  %v2590_v11 = vld [vmem:[%s3858_s11] ss:$0 sm:$0xff]  ;;  %v3557_v24 = vld [vmem:[#allocation6 + $0x8] sm:$0xff]  ;;  %s3155_s16 = smov 64   ;;  %s3156_s8 = smov 80   ;;  %vm2171_vm5 = vcmask 523264  }
  0xa2   : > { %2805 = vmatprep.subr.bf16.mxu1 %v2804_v5  ;;  %v3554_v19 = vld [vmem:[#allocation6] sm:$0xff]  ;;  %s3157_s25 = smov 112   ;;  %s3859_s29 = scalar_lea.vmem [#allocation8], %s3450_s30  ;;  %vm2319_vm6 = vcmask 392192  }
  0xa3   : > { %2807 = vmatpush3.bf16.msra.mxu1 %v2804_v5  ;;  %v778_v48 = vld [vmem:[%s3859_s29] sm:$0xff]  ;;  %s3158_s17 = smov 48   ;;  %s3860_s0 = smov %s3859_s29 }
  0xa4   : > { %2809 = vmatprep.subr.bf16.mxu1 %v2808_v8  ;;  %s3863_s14 = sld [smem:[#allocation27_spill]]  ;;  %s3869_s28 = sld [smem:[#allocation18_spill]] }
  0xa5   : > { %s3160_s10 = smov [#allocation9]  }
  0xa7   : > { %2811 = vmatpush3.bf16.msra.mxu1 %v2808_v8 }
  0xa8   : > { %2700 = vmatprep.subr.mxu1 %v3152_v10 }
  0xaa   : > { %2698 = vmatmul.mubr.msk.f32.vlgmr.msra.gmra.mrb[0].mxu1 %vm791_vm1, %v3521_v9  ;;  %s3864_s1 = scalar_lea.vmem %s3863_s14, %s3459_s15  ;;  %p3872_p5 = scmp.ne.s32.totalorder %s3869_s28, 0 }
  0xab   : > { %2702 = vmatprep.mubr.msk.f32.mxu1 %vm3153_vm2, %v3152_v10  ;;  %s3059_s14 = sshll.u32 %s3160_s10, 4  ;;  %s3060_s14 = int_to_ptr.vmem [resolvable:$false] %s3059_s14 }
 0x17d   : > { %v2699_v12 = vpop.f32.mrb[0].mxu1 }
 0x17e   : > { %v864_v13 = vpop.f32.mrb[1].mxu1  ;;  %v3539_v15 = vadd.f32 %v2699_v12, %v2590_v11 }
 0x17f   : > { %v3536_v14 = vadd.f32 %v2590_v11, %v864_v13 }
 0x181   : > { %878 = vrot.lane.b32.xlu0 %v3536_v14, %s3154_s12 }
 0x185   : > { %956 = vrot.lane.b32.xlu0 %v3539_v15, %s3154_s12 }
 0x1f3   : > { %v879_v16 = vpop.permute.xlu0 %878 }
 0x1f4   : > { %2701 = vmatpush3.xpose.msk.msra.mxu1 %vm880_vm3, %v879_v16 }
 0x1f5   : > { %2705 = vmatprep.subr.mxu1 %v3152_v10 }
 0x1f7   : > { %2703 = vmatmul.mubr.msk.f32.vlgmr.msra.gmra.mrb[2].mxu1 %vm880_vm3, %v3536_v14  ;;  %v957_v17 = vpop.permute.xlu0 %956 }
 0x1f8   : > { %2706 = vmatpush3.xpose.msk.msra.mxu1 %vm880_vm3, %v957_v17  ;;  %2707 = vmatprep.mubr.msk.f32.mxu1 %vm3153_vm2, %v3152_v10 }
 0x1f9   : > { %2715 = vmatprep.subr.mxu1 %v3152_v10 }
 0x1fb   : > { %2708 = vmatmul.mubr.msk.f32.vlgmr.msra.gmra.mrb[4].mxu1 %vm880_vm3, %v3539_v15 }
 0x1fc   : > { %2717 = vmatprep.mubr.msk.f32.mxu1 %vm3153_vm2, %v3152_v10 }
 0x2ca   : > { %v951_v18 = vpop.f32.mrb[2].mxu1 }
 0x2cb   : > { %v1032_v20 = vmul.f32 0.25, %v951_v18  ;;  %v2704_v21 = vpop.f32.mrb[3].mxu1 }
 0x2cd   : > { %v1034_v22 = vadd.f32 %v1032_v20, %v3554_v19 }
 0x2ce   : > { %v1028_v23 = vpop.f32.mrb[4].mxu1 }
 0x2cf   : > { %v1033_v25 = vmul.f32 0.25, %v1028_v23  ;;  %v2709_v26 = vpop.f32.mrb[5].mxu1  ;;  %v1037_v27 = vsel %vm1036_vm4, %v1034_v22, -inf }
 0x2d0   : > { %1038 = vmax.xlane.f32.xlu1 %v1037_v27 }
 0x2d1   : > { %v1035_v28 = vadd.f32 %v1033_v25, %v3557_v24 }
 0x2d3   : > { %v1040_v29 = vsel %vm1036_vm4, %v1035_v28, -inf }
 0x2d4   : > { %1041 = vmax.xlane.f32.xlu1 %v1040_v29 }
 0x2e5   : > { %1059 = vrot.lane.b32.xlu1 %v3536_v14, %s3155_s16 }
 0x2e9   : > { %1135 = vrot.lane.b32.xlu1 %v3539_v15, %s3155_s16 }
 0x2ed   : > { %1358 = vrot.lane.b32.xlu1 %v3536_v14, %s3156_s8 }
 0x35d   : > { %v1039_v30 = vpop.xlane.xlu1 %1038 }
 0x35e   : > { %v1043_v31 = vsub.f32 %v1034_v22, %v1039_v30 }
 0x360   : > { %v1045_v32 = vmul.f32 1.442695, %v1043_v31  ;;  %v875_v31 = vld [vmem:[%s3472_s26 + $0x10] sm:$0xff] }
 0x361   : > { %v1042_v33 = vpop.xlane.xlu1 %1041 }
 0x362   : > { %2941 = vpow2.f32 %v1045_v32  ;;  %v1044_v34 = vsub.f32 %v1035_v28, %v1042_v33  ;;  %v876_v32 = vld [vmem:[%s3472_s26 + $0x18] sm:$0xff] }
 0x363   : > { %v2812_v33 = vpack.c.bf16 %v876_v32, %v875_v31  ;;  %v2160_v32 = vld [vmem:[%s3499_s20 + $0x20] sm:$0xff] }
 0x364   : > { %v1047_v35 = vmul.f32 1.442695, %v1044_v34  ;;  %v873_v34 = vld [vmem:[%s3472_s26] sm:$0xff] }
 0x365   : > { %v1060_v36 = vpop.permute.xlu1 %1059 }
 0x366   : > { %2943 = vpow2.f32 %v1047_v35  ;;  %2711 = vmatpush3.msra.mxu0 %v1060_v36  ;;  %v874_v35 = vld [vmem:[%s3472_s26 + $0x8] sm:$0xff]  ;;  %s2634_s26 = sshll.u32 %s3137_s21, 8  ;;  %s3871_s21 = sand.u32 1, %s3129_s19  }
 0x367   : > { %2720 = vmatprep.subr.mxu0 %v3152_v10 }
 0x369   : > { %v1136_v37 = vpop.permute.xlu1 %1135 }
 0x36a   : > { %2716 = vmatpush3.msra.mxu1 %v1136_v37 }
 0x36b   : > { %2725 = vmatprep.subr.mxu1 %v3152_v10 }
 0x36c   : > { %v2942_v38 = vpop.eup %2941 }
 0x36d   : > { %v1049_v39 = vsel %vm1036_vm4, %v2942_v38, 0.0  ;;  %v1359_v42 = vpop.permute.xlu1 %1358 }
 0x36e   : > { %1050 = vadd.xlane.f32.xlu0 %v1049_v39 }
 0x370   : > { %v2944_v40 = vpop.eup %2943 }
 0x371   : > { %v1052_v41 = vsel %vm1036_vm4, %v2944_v40, 0.0 }
 0x372   : > { %1053 = vadd.xlane.f32.xlu1 %v1052_v41 }
 0x383   : > { %1436 = vrot.lane.b32.xlu1 %v3539_v15, %s3156_s8  ;;  %s3159_s8 = smov 32  }
 0x384   : > { %1356 = vrot.lane.b32.xlu0 %v3536_v14, %s3157_s25 }
 0x387   : > { %1434 = vrot.lane.b32.xlu1 %v3539_v15, %s3157_s25 }
 0x3fb   : > { %v1051_v43 = vpop.xlane.xlu0 %1050 }
 0x3fc   : > { %2945 = vrcp.f32 %v1051_v43 }
 0x3ff   : > { %v1054_v44 = vpop.xlane.xlu1 %1053  ;;  %v1357_v51 = vpop.permute.xlu0 %1356 }
 0x400   : > { %2947 = vrcp.f32 %v1054_v44 }
 0x403   : > { %v1437_v50 = vpop.permute.xlu1 %1436 }
 0x406   : > { %v2946_v45 = vpop.eup %2945 }
 0x407   : > { %v1056_v46 = vmul.f32 %v2946_v45, %v2942_v38  ;;  %v1435_v52 = vpop.permute.xlu1 %1434 }
 0x409   : > { %2713 = vmatmul.mubr.msk.f32.vlgmr.msra.gmra.mrb[0].mxu0 %vm1036_vm4, %v1056_v46  ;;  %v2613_v46 = vld [vmem:[%s3861_s9] ss:$0 sm:$0xff]  ;;  %s2340_s9 = sshll.u32 %s3514_s18, 4  ;;  %s3722_s9 = int_to_ptr.vmem [resolvable:$true] %s2340_s9 }
 0x40a   : > { %v2948_v47 = vpop.eup %2947  ;;  %2721 = vmatpush3.msra.mxu0 %v1060_v36  ;;  %2722 = vmatprep.mubr.msk.f32.mxu0 %vm3153_vm2, %v3152_v10  ;;  %v2816_v36 = vpack.c.bf16 %v874_v35, %v873_v34  ;;  %v2162_v35 = vld [vmem:[%s3499_s20 + $0x30] sm:$0xff]  ;;  %s3055_s24 = scalar_lea.vmem %s3722_s9, 256  ;;  %p3062_p13 = scmp.lt.s32.totalorder %s3722_s9, %s3060_s14 }
 0x40b   : > { %v1058_v49 = vmul.f32 %v2948_v47, %v2944_v40  ;;  %2730 = vmatprep.subr.mxu0 %v3152_v10  ;;  %p3056_p9 = scmp.ne.s32.totalorder %s3722_s9, %s3055_s24 }
 0x40d   : > { %2718 = vmatmul.mubr.msk.f32.vlgmr.msra.gmra.mrb[6].mxu1 %vm1036_vm4, %v1058_v49  ;;  %2723 = vmatmul.mubr.msk.f32.vlgmr.msra.gmra.mrb[2].mxu0 %vm1036_vm4, %v778_v48  ;;  %p3057_p8 = pnand %p3056_p9, %p3872_p5 }
 0x40e   : > { %2726 = vmatpush3.msra.mxu1 %v1136_v37  ;;  %2727 = vmatprep.mubr.msk.f32.mxu1 %vm3153_vm2, %v3152_v10 }
 0x40f   : > { %2732 = vmatprep.mubr.msk.f32.mxu0 %vm3153_vm2, %v3152_v10  ;;  %2735 = vmatprep.subr.mxu1 %v3152_v10  ;;  %p3058_p0 = pneg %p3057_p8 }
 0x411   : > { %2731 = vmatpush3.xpose.msk.msra.mxu0 %vm880_vm3, %v1359_v42  ;;  %2728 = vmatmul.mubr.msk.f32.vlgmr.msra.gmra.mrb[8].mxu1 %vm1036_vm4, %v778_v48 }
 0x412   : > { %2737 = vmatprep.mubr.msk.f32.mxu1 %vm3153_vm2, %v3152_v10  ;;  %2740 = vmatprep.subr.mxu0 %v3152_v10 }
 0x414   : > { %2733 = vmatmul.mubr.msk.f32.vlgmr.msra.gmra.mrb[4].mxu0 %vm880_vm3, %v1357_v51 }
 0x415   : > { %2736 = vmatpush3.xpose.msk.msra.mxu1 %vm880_vm3, %v1437_v50  ;;  %2742 = vmatprep.mubr.msk.f32.mxu0 %vm3153_vm2, %v3152_v10 }
 0x416   : > { %2745 = vmatprep.subr.mxu1 %v3152_v10 }
 0x418   : > { %2738 = vmatmul.mubr.msk.f32.vlgmr.msra.gmra.mrb[10].mxu1 %vm880_vm3, %v1435_v52 }
 0x419   : > { %2747 = vmatprep.mubr.msk.f32.mxu1 %vm3153_vm2, %v3152_v10 }
 0x4dc   : > { %v3598_v53 = vpop.f32.mrb[0].mxu0 }
 0x4dd   : > { %v2714_v54 = vpop.f32.mrb[1].mxu0 }
 0x4e0   : > { %v3600_v55 = vpop.f32.mrb[6].mxu1  ;;  %v1280_v56 = vpop.f32.mrb[2].mxu0 }
 0x4e1   : > { %v3603_v57 = vadd.f32 %v1280_v56, %v3598_v53  ;;  %v2719_v58 = vpop.f32.mrb[7].mxu1  ;;  %v2724_v59 = vpop.f32.mrb[3].mxu0 }
 0x4e4   : > { %v1350_v60 = vpop.f32.mrb[8].mxu1 }
 0x4e5   : > { %v3606_v61 = vadd.f32 %v1350_v60, %v3600_v55  ;;  %v2729_v62 = vpop.f32.mrb[9].mxu1 }
 0x4e7   : > { %v1430_v63 = vpop.f32.mrb[4].mxu0 }
 0x4e8   : > { %v1512_v0 = vmul.f32 0.25, %v1430_v63  ;;  %v2734_v1 = vpop.f32.mrb[5].mxu0 }
 0x4e9   : > { %v2053_v1 = vld [vmem:[%s3489_s3] sm:$0xff] }
 0x4ea   : > { %v1514_v2 = vadd.f32 %v1512_v0, %v3554_v19 }
 0x4eb   : > { %v1508_v3 = vpop.f32.mrb[10].mxu1 }
 0x4ec   : > { %v1513_v4 = vmul.f32 0.25, %v1508_v3  ;;  %v2739_v5 = vpop.f32.mrb[11].mxu1  ;;  %v1516_v6 = vsel %vm1036_vm4, %v1514_v2, -inf }
 0x4ed   : > { %1517 = vmax.xlane.f32.xlu1 %v1516_v6  ;;  %v2056_v5 = vld [vmem:[%s3489_s3 + $0x18] sm:$0xff] }
 0x4ee   : > { %v1515_v8 = vadd.f32 %v1513_v4, %v3557_v24  ;;  %v2055_v4 = vld [vmem:[%s3489_s3 + $0x10] sm:$0xff] }
 0x4ef   : > { %v2824_v6 = vpack.c.bf16 %v2056_v5, %v2055_v4 }
 0x4f0   : > { %v1519_v11 = vsel %vm1036_vm4, %v1515_v8, -inf }
 0x4f1   : > { %1520 = vmax.xlane.f32.xlu0 %v1519_v11 }
 0x507   : > { %1614 = vrot.lane.b32.xlu0 %v3539_v15, %s3158_s17 }
 0x57a   : > { %v1518_v12 = vpop.xlane.xlu1 %1517 }
 0x57b   : > { %v1522_v13 = vsub.f32 %v1514_v2, %v1518_v12  ;;  %v2054_v2 = vld [vmem:[%s3489_s3 + $0x8] sm:$0xff]  ;;  %s3862_s3 = scalar_lea.vmem %s3786_s7, %s3459_s15 }
 0x57c   : > { %v2820_v3 = vpack.c.bf16 %v2054_v2, %v2053_v1 }
 0x57d   : > { %v1524_v16 = vmul.f32 1.442695, %v1522_v13 }
 0x57e   : > { %v1521_v17 = vpop.xlane.xlu0 %1520 }
 0x57f   : > { %2949 = vpow2.f32 %v1524_v16  ;;  %v1523_v18 = vsub.f32 %v1515_v8, %v1521_v17 }
 0x581   : > { %v1526_v19 = vmul.f32 1.442695, %v1523_v18 }
 0x582   : > { %v1615_v20 = vpop.permute.xlu0 %1614 }
 0x583   : > { %2951 = vpow2.f32 %v1526_v19  ;;  %2746 = vmatpush3.msra.mxu1 %v1615_v20  ;;  %v2614_v19 = vld [vmem:[%s3862_s3] ss:$0 sm:$0xff]  ;;  %s3732_s3 = scalar_lea.sflag [#allocation5], %s3871_s21 }
 0x584   : > { %2755 = vmatprep.subr.mxu1 %v3152_v10 }
 0x589   : > { %v2950_v21 = vpop.eup %2949 }
 0x58a   : > { %v1528_v22 = vsel %vm1036_vm4, %v2950_v21, 0.0 }
 0x58b   : > { %1529 = vadd.xlane.f32.xlu1 %v1528_v22 }
 0x58d   : > { %v2952_v23 = vpop.eup %2951 }
 0x58e   : > { %v1531_v24 = vsel %vm1036_vm4, %v2952_v23, 0.0 }
 0x58f   : > { %1532 = vadd.xlane.f32.xlu1 %v1531_v24 }
 0x5a0   : > { %1538 = vrot.lane.b32.xlu1 %v3536_v14, %s3158_s17  ;;  %v779_v14 = vld [vmem:[%s3860_s0 + $0x8] sm:$0xff] }
 0x618   : > { %v1530_v15 = vpop.xlane.xlu1 %1529 }
 0x619   : > { %2953 = vrcp.f32 %v1530_v15 }
 0x61c   : > { %v1533_v25 = vpop.xlane.xlu1 %1532 }
 0x61d   : > { %2955 = vrcp.f32 %v1533_v25 }
 0x620   : > { %v1539_v26 = vpop.permute.xlu1 %1538 }
 0x621   : > { %2741 = vmatpush3.msra.mxu0 %v1539_v26 }
 0x622   : > { %2750 = vmatprep.subr.mxu0 %v3152_v10 }
 0x623   : > { %v2954_v27 = vpop.eup %2953 }
 0x624   : > { %v1535_v28 = vmul.f32 %v2954_v27, %v2950_v21  ;;  %v2156_v27 = vld [vmem:[%s3499_s20] sm:$0xff] }
 0x626   : > { %2743 = vmatmul.mubr.msk.f32.vlgmr.msra.gmra.mrb[6].mxu0 %vm1036_vm4, %v1535_v28  ;;  %v2157_v28 = vld [vmem:[%s3499_s20 + $0x8] sm:$0xff] }
 0x627   : > { %v2956_v29 = vpop.eup %2955  ;;  %2751 = vmatpush3.msra.mxu0 %v1539_v26  ;;  %2752 = vmatprep.mubr.msk.f32.mxu0 %vm3153_vm2, %v3152_v10 }
 0x628   : > { %v1537_v30 = vmul.f32 %v2956_v29, %v2952_v23  ;;  %2813 = vmatprep.subr.bf16.mxu0 %v2812_v33  ;;  %v2615_v23 = vld [vmem:[%s3864_s1] ss:$0 sm:$0xff]  ;;  %v2828_v29 = vpack.c.bf16 %v2157_v28, %v2156_v27  ;;  %s3061_s1 = scalar_lea.vmem %s3060_s14, 512 }
 0x629   : > { %p3063_p1 = scmp.lt.s32.totalorder %s3061_s1, %s3055_s24 }
 0x62a   : > { %2748 = vmatmul.mubr.msk.f32.vlgmr.msra.gmra.mrb[12].mxu1 %vm1036_vm4, %v1537_v30  ;;  %2753 = vmatmul.mubr.msk.f32.vlgmr.msra.gmra.mrb[8].mxu0 %vm1036_vm4, %v779_v14  ;;  %v2159_v30 = vld [vmem:[%s3499_s20 + $0x18] sm:$0xff] }
 0x62b   : > { %2756 = vmatpush3.msra.mxu1 %v1615_v20  ;;  %2757 = vmatprep.mubr.msk.f32.mxu1 %vm3153_vm2, %v3152_v10  ;;  %p3064_p7 = por %p3063_p1, %p3062_p13 }
 0x62c   : > { %2815 = vmatpush3.bf16.msra.mxu0 %v2812_v33  ;;  %2821 = vmatprep.subr.bf16.mxu1 %v2820_v3  ;;  %v2161_v33 = vld [vmem:[%s3499_s20 + $0x28] sm:$0xff] }
 0x62d   : > { %2817 = vmatprep.subr.bf16.mxu0 %v2816_v36  ;;  %v2836_v34 = vpack.c.bf16 %v2161_v33, %v2160_v32  ;;  %p3065_p10 = pnand %p3064_p7, %p3058_p0 }
 0x62e   : > { %2758 = vmatmul.mubr.msk.f32.vlgmr.msra.gmra.mrb[14].mxu1 %vm1036_vm4, %v779_v14  ;;  %v2158_v14 = vld [vmem:[%s3499_s20 + $0x10] sm:$0xff] }
 0x62f   : > { %2823 = vmatpush3.bf16.msra.mxu1 %v2820_v3  ;;  %v2832_v31 = vpack.c.bf16 %v2159_v30, %v2158_v14 }
 0x630   : > { %2825 = vmatprep.subr.bf16.mxu1 %v2824_v6 }
 0x633   : > { %2827 = vmatpush3.bf16.msra.mxu1 %v2824_v6 }
 0x6f9   : > { %v3634_v37 = vpop.f32.mrb[6].mxu0 }
 0x6fa   : > { %v2744_v38 = vpop.f32.mrb[7].mxu0 }
 0x6fd   : > { %v3636_v39 = vpop.f32.mrb[12].mxu1  ;;  %v1759_v40 = vpop.f32.mrb[8].mxu0 }
 0x6fe   : > { %v1833_v10 = vadd.f32 %v1759_v40, %v3634_v37  ;;  %v2749_v41 = vpop.f32.mrb[13].mxu1  ;;  %v2754_v42 = vpop.f32.mrb[9].mxu0  ;;  %v2616_v40 = vld [vmem:[%s749_s22] ss:$0 sm:$0xff] }
 0x700   : > { %2764 = vmatprep.mubr.msk.f32.mxu0 %vm880_vm3, %v1833_v10 }
 0x701   : > { %v1829_v43 = vpop.f32.mrb[14].mxu1 }
 0x702   : > { %v1834_v44 = vadd.f32 %v1829_v43, %v3636_v39  ;;  %v2759_v45 = vpop.f32.mrb[15].mxu1 }
 0x704   : > { %2765 = vmatmul.mubr.msk.f32.vlgmr.msra.gmra.mrb[10].mxu0 %vm880_vm3, %v1834_v44 }
 0x705   : > { %2819 = vmatpush3.bf16.msra.mxu0 %v2816_v36  ;;  %2771 = vmatprep.mubr.msk.f32.mxu0 %vm880_vm3, %v3603_v57  ;;  %v2163_v36 = vld [vmem:[%s3499_s20 + $0x38] sm:$0xff] }
 0x706   : > { %2829 = vmatprep.subr.bf16.mxu0 %v2828_v29  ;;  %v2840_v38 = vpack.c.bf16 %v2163_v36, %v2162_v35 }
 0x70c   : > { %2772 = vmatmul.mubr.msk.f32.vlgmr.msra.gmra.mrb[10].mxu0 %vm880_vm3, %v3606_v61 }
 0x70d   : > { %2831 = vmatpush3.bf16.msra.mxu0 %v2828_v29 }
 0x70e   : > { %2833 = vmatprep.subr.bf16.mxu0 %v2832_v31 }
 0x711   : > { %2835 = vmatpush3.bf16.msra.mxu0 %v2832_v31 }
 0x712   : > { %2837 = vmatprep.subr.bf16.mxu0 %v2836_v34 }
 0x715   : > { %2839 = vmatpush3.bf16.msra.mxu0 %v2836_v34 }
 0x716   : > { %2841 = vmatprep.subr.bf16.mxu0 %v2840_v38 }
 0x719   : > { %2843 = vmatpush3.bf16.msra.mxu0 %v2840_v38 }
 0x7df   : > { %v2773_v47 = vpop.f32.mrb[10].mxu0 }
 0x7e0   : > { %v2005_v48 = vadd.f32 %v2773_v47, %v2613_v46  ;;  %v1988_v49 = vpop.f32.mrb[11].mxu0 }
 0x7e1   : > { %v2004_v50 = vadd.f32 %v2613_v46, %v1988_v49 }
 0x7e2   : > { %v2007_v51 = vadd.f32 %v2005_v48, %v3521_v9 }
 0x7e3   : > { %v2006_v52 = vadd.f32 %v2004_v50, %v3517_v7 }
 0x7e4   : > { %v2013_v54 = vsel %vm791_vm1, %v2007_v51, 0.0 }
 0x7e5   : > { %2014 = vadd.xlane.f32.xlu0 %v2013_v54  ;;  %v2010_v56 = vsel %vm791_vm1, %v2006_v52, 0.0 }
 0x7e6   : > { %2011 = vadd.xlane.f32.xlu1 %v2010_v56  ;;  %v2619_v56 = vld [vmem:[%s757_s2] ss:$0 sm:$0xff] }
 0x872   : > { %v2015_v57 = vpop.xlane.xlu0 %2014 }
 0x873   : > { %v2018_v58 = vmul.f32 0.03125, %v2015_v57  ;;  %v2012_v59 = vpop.xlane.xlu1 %2011 }
 0x874   : > { %v2017_v60 = vmul.f32 0.03125, %v2012_v59 }
 0x875   : > { %v2020_v61 = vsub.f32 %v2007_v51, %v2018_v58 }
 0x876   : > { %v2019_v62 = vsub.f32 %v2006_v52, %v2017_v60 }
 0x877   : > { %v2022_v63 = vmul.f32 %v2020_v61, %v2020_v61 }
 0x878   : > { %v2021_v9 = vmul.f32 %v2019_v62, %v2019_v62 }
 0x879   : > { %v2026_v7 = vsel %vm791_vm1, %v2022_v63, 0.0 }
 0x87a   : > { %2027 = vadd.xlane.f32.xlu0 %v2026_v7  ;;  %v2023_v0 = vsel %vm791_vm1, %v2021_v9, 0.0 }
 0x87b   : > { %2024 = vadd.xlane.f32.xlu1 %v2023_v0 }
 0x907   : > { %v2028_v8 = vpop.xlane.xlu0 %2027 }
 0x908   : > { %v2030_v11 = vmul.f32 0.03125, %v2028_v8  ;;  %v2025_v12 = vpop.xlane.xlu1 %2024 }
 0x909   : > { %v2029_v13 = vmul.f32 0.03125, %v2025_v12 }
 0x90a   : > { %v2032_v16 = vadd.f32 1e-12, %v2030_v11 }
 0x90b   : > { %v2031_v17 = vadd.f32 1e-12, %v2029_v13 }
 0x90c   : > { %2957 = vrsqrt.f32 %v2032_v16 }
 0x90d   : > { %2959 = vrsqrt.f32 %v2031_v17 }
 0x916   : > { %v2958_v18 = vpop.eup %2957 }
 0x917   : > { %v2960_v20 = vpop.eup %2959  ;;  %v2036_v21 = vmul.f32 %v2958_v18, %v2020_v61 }
 0x918   : > { %v2035_v22 = vmul.f32 %v2960_v20, %v2019_v62 }
 0x919   : > { %v2044_v24 = vmul.f32 %v2614_v19, %v2036_v21 }
 0x91a   : > { %v2043_v15 = vmul.f32 %v2614_v19, %v2035_v22  ;;  %v2623_v22 = vld [vmem:[%s763_s23] ss:$0 sm:$0xff] }
 0x91b   : > { %v2052_v26 = vadd.f32 %v2615_v23, %v2044_v24 }
 0x91c   : > { %v2051_v25 = vadd.f32 %v2615_v23, %v2043_v15 }
 0x91e   : > { %2782 = vmatprep.mubr.msk.f32.mxu1 %vm791_vm1, %v2051_v25 }
 0x91f   : > { %2783 = vmatmul.mubr.msk.f32.vlgmr.msra.gmra.mrb[16].mxu1 %vm791_vm1, %v2052_v26 }
 0x9f2   : > { %v2784_v10 = vpop.f32.mrb[16].mxu1 }
 0x9f3   : > { %v2142_v41 = vadd.f32 %v2784_v10, %v2616_v40  ;;  %v2136_v42 = vpop.f32.mrb[17].mxu1 }
 0x9f4   : > { %v2137_v43 = vadd.f32 %v2616_v40, %v2136_v42 }
 0x9f5   : > { %v2149_v44 = vmul.f32 0.70710677, %v2142_v41  ;;  %v2146_v51 = vmul.f32 0.5, %v2142_v41 }
 0x9f6   : > { %v2148_v45 = vmul.f32 0.70710677, %v2137_v43  ;;  %v2145_v49 = vmul.f32 0.5, %v2137_v43 }
 0x9f7   : > { %2961 = verf.f32 %v2149_v44 }
 0x9f8   : > { %2963 = verf.f32 %v2148_v45 }
 0xa01   : > { %v2962_v46 = vpop.eup %2961 }
 0xa02   : > { %v2964_v47 = vpop.eup %2963  ;;  %v2153_v48 = vadd.f32 1.0, %v2962_v46 }
 0xa03   : > { %v2152_v50 = vadd.f32 1.0, %v2964_v47 }
 0xa04   : > { %v2155_v54 = vmul.f32 %v2153_v48, %v2146_v51 }
 0xa05   : > { %v2154_v52 = vmul.f32 %v2152_v50, %v2145_v49 }
 0xa07   : > { %2801 = vmatprep.mubr.msk.f32.mxu0 %vm2171_vm5, %v2154_v52 }
 0xa08   : > { %2802 = vmatmul.mubr.msk.f32.vlgmr.msra.gmra.mrb[12].mxu0 %vm2171_vm5, %v2155_v54 }
 0xadb   : > { %v2803_v57 = vpop.f32.mrb[12].mxu0 }
 0xadc   : > { %v2250_v58 = vadd.f32 %v2803_v57, %v2619_v56  ;;  %v2244_v59 = vpop.f32.mrb[13].mxu0 }
 0xadd   : > { %v2245_v60 = vadd.f32 %v2619_v56, %v2244_v59 }
 0xade   : > { %v2254_v61 = vadd.f32 %v2250_v58, %v2052_v26 }
 0xadf   : > { %v2253_v62 = vadd.f32 %v2245_v60, %v2051_v25 }
 0xae0   : > { %v2260_v63 = vsel %vm791_vm1, %v2254_v61, 0.0 }
 0xae1   : > { %2261 = vadd.xlane.f32.xlu0 %v2260_v63  ;;  %v2257_v9 = vsel %vm791_vm1, %v2253_v62, 0.0 }
 0xae2   : > { %2258 = vadd.xlane.f32.xlu1 %v2257_v9 }
 0xaf3   : > { %2303 = vrot.lane.b32.xlu1 %v3598_v53, %s3159_s8 }
 0xaf7   : > { %2311 = vrot.lane.b32.xlu1 %v3634_v37, %s3158_s17 }
 0xb6e   : > { %v2262_v7 = vpop.xlane.xlu0 %2261 }
 0xb6f   : > { %v2264_v0 = vmul.f32 0.03125, %v2262_v7  ;;  %v2259_v1 = vpop.xlane.xlu1 %2258 }
 0xb70   : > { %v2263_v2 = vmul.f32 0.03125, %v2259_v1 }
 0xb71   : > { %v2266_v3 = vsub.f32 %v2254_v61, %v2264_v0 }
 0xb72   : > { %v2265_v4 = vsub.f32 %v2253_v62, %v2263_v2 }
 0xb73   : > { %v2268_v5 = vmul.f32 %v2266_v3, %v2266_v3  ;;  %v2304_v53 = vpop.permute.xlu1 %2303 }
 0xb74   : > { %v2267_v6 = vmul.f32 %v2265_v4, %v2265_v4 }
 0xb75   : > { %v2272_v8 = vsel %vm791_vm1, %v2268_v5, 0.0 }
 0xb76   : > { %2273 = vadd.xlane.f32.xlu0 %v2272_v8  ;;  %v2269_v11 = vsel %vm791_vm1, %v2267_v6, 0.0 }
 0xb77   : > { %2270 = vadd.xlane.f32.xlu1 %v2269_v11  ;;  %v2312_v37 = vpop.permute.xlu1 %2311 }
 0xb88   : > { %2313 = vrot.lane.b32.xlu1 %v3636_v39, %s3158_s17  ;;  %v2622_v39 = vld [vmem:[%s760_s13] ss:$0 sm:$0xff]  ;;  %s3870_s13 = sld [smem:[#allocation34_spill]] }
 0xb8c   : > { %2305 = vrot.lane.b32.xlu0 %v3600_v55, %s3159_s8 }
 0xb8e   : > { %s3720_s27 = scalar_lea.hbm %s3870_s13, %s2634_s26 }
 0xc03   : > { %v2274_v12 = vpop.xlane.xlu0 %2273 }
 0xc04   : > { %v2276_v13 = vmul.f32 0.03125, %v2274_v12  ;;  %v2271_v16 = vpop.xlane.xlu1 %2270 }
 0xc05   : > { %v2275_v17 = vmul.f32 0.03125, %v2271_v16 }
 0xc06   : > { %v2278_v18 = vadd.f32 1e-12, %v2276_v13 }
 0xc07   : > { %v2277_v19 = vadd.f32 1e-12, %v2275_v17  ;;  %v2306_v26 = vpop.permute.xlu0 %2305 }
 0xc08   : > { %2965 = vrsqrt.f32 %v2278_v18  ;;  %v2314_v29 = vpop.permute.xlu1 %2313 }
 0xc09   : > { %2967 = vrsqrt.f32 %v2277_v19 }
 0xc12   : > { %v2966_v20 = vpop.eup %2965 }
 0xc13   : > { %v2968_v21 = vpop.eup %2967  ;;  %v2282_v55 = vmul.f32 %v2966_v20, %v2266_v3 }
 0xc14   : > { %v2281_v23 = vmul.f32 %v2968_v21, %v2265_v4 }
 0xc15   : > { %v2290_v24 = vmul.f32 %v2622_v39, %v2282_v55 }
 0xc16   : > { %v2289_v15 = vmul.f32 %v2622_v39, %v2281_v23 }
 0xc17   : > { %v2298_v25 = vadd.f32 %v2623_v22, %v2290_v24 }
 0xc18   : > { %v2297_v27 = vadd.f32 %v2623_v22, %v2289_v15 }
 0xc19   : > { %2300 = vst.msk [vmem:[#allocation2 + $0x8] sm:$0xff] %vm791_vm1, %v2298_v25  ;;  %v2318_v28 = vsel %vm791_vm1, %v2298_v25, %v2306_v26 }
 0xc1a   : > { %2299 = vst.msk [vmem:[#allocation2] sm:$0xff] %vm791_vm1, %v2297_v27  ;;  %v2317_v14 = vsel %vm791_vm1, %v2297_v27, %v2304_v53  ;;  %v2321_v30 = vsel %vm2319_vm6, %v2318_v28, %v2314_v29 }
 0xc1b   : > { %v2320_v31 = vsel %vm2319_vm6, %v2317_v14, %v2312_v37  ;;  %2323 = vst.msk [vmem:[%s3514_s18 + $0x8] sm:$0xff] %vm2171_vm5, %v2321_v30 }
 0xc1c   : > { %2322 = vst.msk [vmem:[%s3514_s18] sm:$0xff] %vm2171_vm5, %v2320_v31 }
 0xc1d   : > { %3068 = shalt.err (!%p3065_p10)
}
 0xc1e   : > { %s3069_s18 = scalar_lea.hbm %s3720_s27, 256  ;;  %s3073_s12 = scalar_lea.hbm %s3870_s13, 512 }
 0xc1f   : > { %p3070_p11 = scmp.ne.s32.totalorder %s3720_s27, %s3069_s18  ;;  %p3074_p12 = scmp.lt.u32.totalorder %s3720_s27, %s3870_s13 }
 0xc20   : > { %p3075_p2 = scmp.lt.u32.totalorder %s3073_s12, %s3069_s18  ;;  %p3077_p9 = scmp.lt.u32.totalorder %s3069_s18, %s3720_s27 }
 0xc21   : > { %p3071_p4 = pnand %p3070_p11, %p3872_p5 }
 0xc22   : > { %p3076_p6 = por %p3075_p2, %p3074_p12 }
 0xc23   : > { %p3072_p3 = pneg %p3071_p4 }
 0xc24   : > { %p3078_p8 = por %p3077_p9, %p3076_p6 }
 0xc26   : > { %p3079_p0 = pnand %p3078_p8, %p3072_p3 }
 0xc28   : > { %3082 = shalt.err (!%p3079_p0)
}
 0xc29   : > { %s3161_s16 = smov 128   ;;  %s3162_s8 = smov 8  }
 0xc2a   : > { %2856 = dma.vmem_to_hbm [thread:$0]  (%p3872_p5), %s3722_s9, 256, %s3720_s27, %s3732_s3, %s3161_s16, %s3161_s16, %s3162_s8  }
 0xc2b PF: > { %s3873_s2 = sld [smem:[#allocation14_spill]]  ;;  %s3874_s25 = sld [smem:[#allocation19_spill]] }
 0xc2c   : > { %s3875_s29 = sld [smem:[#allocation17_spill]] }
 0xc31   : > { %s2355_s17 = sand.u32 1, %s3873_s2   ;;  %p3876_p13 = scmp.ne.s32.totalorder %s3874_s25, 0 }
 0xc32   : > { %p3877_p1 = scmp.ge.s32.totalorder %s3875_s29, 2  ;;  %s2356_s0 = scalar_lea.sflag [#allocation5], %s2355_s17 }
 0xc34   : > { %p2870_p7 = pnand %p3877_p1, %p3876_p13 }
 0xc36   : > { %3120 = dma.done.wait (!%p2870_p7), %s2356_s0, 256  }
 0xc37   : > { %3122 = vsyncadd (!%p2870_p7), %s2356_s0, 4294967040  ;;  %s30_s23 = sadd.s32 1, %s3875_s29   ;;  %s3878_s30 = sld [smem:[#allocation15_spill]] }
 0xc38   : > { %p27_p10 = scmp.ge.s32.totalorder %s30_s23, 4   ;;  %s3879_s20 = sld [smem:[#allocation21_spill]] }
 0xc39   : > { %s3880_s21 = sld [smem:[#allocation16_spill]]  ;;  %s3881_s22 = sld [smem:[#allocation20_spill]] }
 0xc3a   : > { %s3882_s18 = smov %s3129_s19  ;;  %29 = sbr.rel (!%p27_p10) target bundleno = 20 (0x14), region = 174 }
 0xc3d   : > { %s3883_s19 = smov %s3878_s30 }
 0xc41   :  { %2361 = vsyncpa [#allocation4], 1 }
 0xc42   :  { %2363 = vsyncpa [#allocation4 + $0x1], 1 }
 0xc43   :  { %2364 = vsyncpa [#allocation7], 1 }
 0xc44   :  { %2365 = vsyncpa [#allocation5], 1 }
 0xc45   :  { %2367 = vsyncpa [#allocation5 + $0x1], 1 }

</bundles_post_ra>
